<compile_context>
chip_gen: v6e
topology: v6e:2x2x1
jax: 0.10.0
libtpu: 0.0.40
codegen_flags: <defaults>
</compile_context>

<pallas_src>
import functools

import jax
import jax.numpy as jnp
from jax.experimental import pallas as pl
from jax.experimental.pallas import tpu as pltpu


CFG = dict(
    vocab=100, max_pos=16, type_vocab=2,
    hidden=32, heads=2, layers=2, inter=64,
    num_labels=5,
)
_LANE = 128      # lane-dense padded width of the logits output
_OUT_ROWS = 8    # sublane-padded rows of the output block
_LN_EPS = 1e-12


# ------------------------------ fused kernel -------------------------------

def _fused_forward_kernel(
    x_ref, maskb_ref,                         # per-batch activations / mask bias
    eg_ref, eb_ref,                           # embedding LayerNorm
    wqkv_ref, bqkv_ref, wo_ref, bo_ref,       # stacked per-layer attention weights
    g1_ref, b1_ref,                           # post-attention LayerNorm
    wi_ref, bi_ref, wd_ref, bd_ref,           # FFN
    g2_ref, b2_ref,                           # post-FFN LayerNorm
    pw_ref, pb_ref,                           # pooler
    fw_ref, fb_ref,                           # classifier head (lane-padded to 128)
    o_ref,                                    # (1, 8, 128) output block
    *, num_layers, num_heads, head_dim, scale,
):
    x = x_ref[0]                  # (S, H) f32
    mask_bias = maskb_ref[0]      # (1, S) f32, already (1 - m) * -1e9

    H = num_heads * head_dim

    def layernorm(h, g, b):
        mu = jnp.mean(h, axis=-1, keepdims=True)
        var = jnp.mean((h - mu) ** 2, axis=-1, keepdims=True)
        return (h - mu) * jax.lax.rsqrt(var + _LN_EPS) * g + b

    def mxu(a, w):                # bf16 operands on the MXU, f32 accumulation
        return jax.lax.dot_general(
            a.astype(jnp.bfloat16), w,
            (((1,), (0,)), ((), ())),
            preferred_element_type=jnp.float32)

    # --- embedding LayerNorm (no residual / no zero tensor) ---
    x = layernorm(x, eg_ref[...], eb_ref[...])

    # --- transformer encoder layers (static, unrolled) ---
    for l in range(num_layers):
        # packed QKV projection: one (H, 3H) matmul
        qkv = mxu(x, wqkv_ref[l]) + bqkv_ref[l]              # (S, 3H) f32

        ctx_heads = []
        for h in range(num_heads):
            lo, hi = h * head_dim, (h + 1) * head_dim
            q = qkv[:, lo:hi]                                # (S, Dh)
            k = qkv[:, H + lo:H + hi]
            v = qkv[:, 2 * H + lo:2 * H + hi]
            # scores (S, S): contract on head_dim, no transpose materialized
            s = jax.lax.dot_general(
                q, k, (((1,), (1,)), ((), ())),
                preferred_element_type=jnp.float32) * scale
            s = s + mask_bias                                # broadcast over query rows
            s = s - jnp.max(s, axis=-1, keepdims=True)
            p = jnp.exp(s)
            p = p * pl.reciprocal(jnp.sum(p, axis=-1, keepdims=True), approx=True)
            ctx_heads.append(jnp.dot(p, v, preferred_element_type=jnp.float32))
        ctx = jnp.concatenate(ctx_heads, axis=-1)            # (S, H)

        attn_out = mxu(ctx, wo_ref[l]) + bo_ref[l]
        x = layernorm(attn_out + x, g1_ref[l], b1_ref[l])

        ffn = mxu(x, wi_ref[l]) + bi_ref[l]
        # tanh-approx GELU on VPU/EUP
        # TODO(synk): HF bert-base uses erf-based GELU; swap if bit-level parity matters.
        ffn = 0.5 * ffn * (1.0 + jnp.tanh(
            0.7978845608028654 * (ffn + 0.044715 * ffn * ffn * ffn)))
        ffn = mxu(ffn, wd_ref[l]) + bd_ref[l]
        x = layernorm(ffn + x, g2_ref[l], b2_ref[l])

    # --- pooler (dense + tanh on the [CLS] row) fused with the 5-way head ---
    cls = x[0:1, :]                                          # (1, H)
    pooled = jnp.tanh(mxu(cls, pw_ref[...]) + pb_ref[...])
    # dropout(p=0.28) is a no-op in the reference forward (its result is overwritten).
    logits = mxu(pooled, fw_ref[...]) + fb_ref[...]          # (1, 128) lane-dense

    o_ref[0] = jnp.broadcast_to(logits, o_ref.shape[1:]).astype(o_ref.dtype)


# ----------------------------- model definition ------------------------------

def init_params(key, cfg):
    H, I, L = cfg["hidden"], cfg["inter"], cfg["layers"]

    def nrm(k, shape, std=0.02):
        return (std * jax.random.normal(k, shape)).astype(jnp.float32)

    keys = iter(jax.random.split(key, 64))

    wq = nrm(next(keys), (L, H, H))
    wk = nrm(next(keys), (L, H, H))
    wv = nrm(next(keys), (L, H, H))

    p = {
        "word_emb": nrm(next(keys), (cfg["vocab"], H)),
        "pos_emb": nrm(next(keys), (cfg["max_pos"], H)),
        "type_emb": nrm(next(keys), (cfg["type_vocab"], H)),
        "emb_ln_g": jnp.ones((1, H), jnp.float32),
        "emb_ln_b": jnp.zeros((1, H), jnp.float32),
        # packed QKV projection: (L, H, 3H), bf16 weights for the MXU
        "wqkv": jnp.concatenate([wq, wk, wv], axis=-1).astype(jnp.bfloat16),
        "bqkv": jnp.zeros((L, 1, 3 * H), jnp.float32),
        "wo": nrm(next(keys), (L, H, H)).astype(jnp.bfloat16),
        "bo": jnp.zeros((L, 1, H), jnp.float32),
        "ln1_g": jnp.ones((L, 1, H), jnp.float32),
        "ln1_b": jnp.zeros((L, 1, H), jnp.float32),
        "wi": nrm(next(keys), (L, H, I)).astype(jnp.bfloat16),
        "bi": jnp.zeros((L, 1, I), jnp.float32),
        "wd": nrm(next(keys), (L, I, H)).astype(jnp.bfloat16),
        "bd": jnp.zeros((L, 1, H), jnp.float32),
        "ln2_g": jnp.ones((L, 1, H), jnp.float32),
        "ln2_b": jnp.zeros((L, 1, H), jnp.float32),
        "pool_w": nrm(next(keys), (H, H)).astype(jnp.bfloat16),
        "pool_b": jnp.zeros((1, H), jnp.float32),
    }
    # classifier head nn.Linear(hidden, 5), lane-padded to 128 output columns
    fc_w = nrm(next(keys), (H, cfg["num_labels"]))
    fc_b = jnp.zeros((cfg["num_labels"],), jnp.float32)
    p["fc_w"] = jnp.pad(
        fc_w, ((0, 0), (0, _LANE - cfg["num_labels"]))).astype(jnp.bfloat16)
    p["fc_b"] = jnp.pad(fc_b, (0, _LANE - cfg["num_labels"])).reshape(1, _LANE)
    return p


def _resident_spec(shape):
    """Whole-array VMEM block with a constant index map (stays resident across grid)."""
    nd = len(shape)
    return pl.BlockSpec(shape, lambda b, _nd=nd: (0,) * _nd)


def sentiment_classifier_forward(params, input_ids, attention_mask, cfg=CFG):
    B, S = input_ids.shape
    H, Hn = cfg["hidden"], cfg["heads"]
    Dh = H // Hn

    # Embedding lookup is glue (gather); everything downstream runs inside the kernel.
    emb = (jnp.take(params["word_emb"], input_ids, axis=0)
           + params["pos_emb"][:S][None, :, :]
           + params["type_emb"][0][None, None, :]).astype(jnp.float32)     # (B, S, H)

    # Additive attention-mask bias, computed once and reused by every layer.
    mask_bias = ((1.0 - attention_mask.astype(jnp.float32)) * -1e9).reshape(B, 1, S)

    weights = [
        params["emb_ln_g"], params["emb_ln_b"],
        params["wqkv"], params["bqkv"], params["wo"], params["bo"],
        params["ln1_g"], params["ln1_b"],
        params["wi"], params["bi"], params["wd"], params["bd"],
        params["ln2_g"], params["ln2_b"],
        params["pool_w"], params["pool_b"],
        params["fc_w"], params["fc_b"],
    ]

    kernel = functools.partial(
        _fused_forward_kernel,
        num_layers=cfg["layers"], num_heads=Hn, head_dim=Dh,
        scale=1.0 / (Dh ** 0.5))

    out = pl.pallas_call(
        kernel,
        out_shape=jax.ShapeDtypeStruct((B, _OUT_ROWS, _LANE), jnp.float32),
        grid=(B,),
        in_specs=[
            pl.BlockSpec((1, S, H), lambda b: (b, 0, 0)),     # embedded activations
            pl.BlockSpec((1, 1, S), lambda b: (b, 0, 0)),     # mask bias
        ] + [_resident_spec(w.shape) for w in weights],
        out_specs=pl.BlockSpec((1, _OUT_ROWS, _LANE), lambda b: (b, 0, 0)),
        compiler_params=pltpu.CompilerParams(
            dimension_semantics=("parallel",)),
    )(emb, mask_bias, *weights)

    # Slice the lane/sublane padding off: logits live at row 0, first num_labels lanes.
    return out[:, 0, :cfg["num_labels"]]


# ----------------------------------- main -----------------------------------

if __name__ == "__main__":
    key = jax.random.PRNGKey(0)
    k_param, k_ids = jax.random.split(key)

    B, S = 2, 8
    params = init_params(k_param, CFG)

    input_ids = jax.random.randint(k_ids, (B, S), 0, CFG["vocab"], dtype=jnp.int32)
    # first token is [CLS]-like; the tail of each sequence is padding
    attention_mask = jnp.array(
        [[1, 1, 1, 1, 1, 1, 0, 0],
         [1, 1, 1, 1, 0, 0, 0, 0]], dtype=jnp.int32)

    logits = sentiment_classifier_forward(params, input_ids, attention_mask)
    jax.block_until_ready(logits)
    assert logits.shape == (B, CFG["num_labels"])
    assert bool(jnp.all(jnp.isfinite(logits)))
    print("KERNEL_OK")
</pallas_src>

<mosaic_0001>
module attributes {stable_mosaic.version = 11 : i64} {
  func.func @_fused_forward_kernel(%arg0: i32, %arg1: memref<1x8x32xf32, #tpu.memory_space<vmem>>, %arg2: memref<1x1x8xf32, #tpu.memory_space<vmem>>, %arg3: memref<1x32xf32, #tpu.memory_space<vmem>>, %arg4: memref<1x32xf32, #tpu.memory_space<vmem>>, %arg5: memref<2x32x96xbf16, #tpu.memory_space<vmem>>, %arg6: memref<2x1x96xf32, #tpu.memory_space<vmem>>, %arg7: memref<2x32x32xbf16, #tpu.memory_space<vmem>>, %arg8: memref<2x1x32xf32, #tpu.memory_space<vmem>>, %arg9: memref<2x1x32xf32, #tpu.memory_space<vmem>>, %arg10: memref<2x1x32xf32, #tpu.memory_space<vmem>>, %arg11: memref<2x32x64xbf16, #tpu.memory_space<vmem>>, %arg12: memref<2x1x64xf32, #tpu.memory_space<vmem>>, %arg13: memref<2x64x32xbf16, #tpu.memory_space<vmem>>, %arg14: memref<2x1x32xf32, #tpu.memory_space<vmem>>, %arg15: memref<2x1x32xf32, #tpu.memory_space<vmem>>, %arg16: memref<2x1x32xf32, #tpu.memory_space<vmem>>, %arg17: memref<32x32xbf16, #tpu.memory_space<vmem>>, %arg18: memref<1x32xf32, #tpu.memory_space<vmem>>, %arg19: memref<32x128xbf16, #tpu.memory_space<vmem>>, %arg20: memref<1x128xf32, #tpu.memory_space<vmem>>, %arg21: memref<1x8x128xf32, #tpu.memory_space<vmem>>) attributes {dimension_semantics = [#tpu.dimension_semantics<parallel>], iteration_bounds = array<i64: 2>, scalar_prefetch = 0 : i64, scratch_operands = 0 : i64, tpu.core_type = #tpu.core_type<tc>, window_params = [{transform_indices = @transform_0, window_bounds = array<i64: 1, 8, 32>}, {transform_indices = @transform_1, window_bounds = array<i64: 1, 1, 8>}, {pipeline_mode = #tpu.pipeline_mode<synchronous>, transform_indices = @transform_2, window_bounds = array<i64: 1, 32>}, {pipeline_mode = #tpu.pipeline_mode<synchronous>, transform_indices = @transform_3, window_bounds = array<i64: 1, 32>}, {pipeline_mode = #tpu.pipeline_mode<synchronous>, transform_indices = @transform_4, window_bounds = array<i64: 2, 32, 96>}, {pipeline_mode = #tpu.pipeline_mode<synchronous>, transform_indices = @transform_5, window_bounds = array<i64: 2, 1, 96>}, {pipeline_mode = #tpu.pipeline_mode<synchronous>, transform_indices = @transform_6, window_bounds = array<i64: 2, 32, 32>}, {pipeline_mode = #tpu.pipeline_mode<synchronous>, transform_indices = @transform_7, window_bounds = array<i64: 2, 1, 32>}, {pipeline_mode = #tpu.pipeline_mode<synchronous>, transform_indices = @transform_8, window_bounds = array<i64: 2, 1, 32>}, {pipeline_mode = #tpu.pipeline_mode<synchronous>, transform_indices = @transform_9, window_bounds = array<i64: 2, 1, 32>}, {pipeline_mode = #tpu.pipeline_mode<synchronous>, transform_indices = @transform_10, window_bounds = array<i64: 2, 32, 64>}, {pipeline_mode = #tpu.pipeline_mode<synchronous>, transform_indices = @transform_11, window_bounds = array<i64: 2, 1, 64>}, {pipeline_mode = #tpu.pipeline_mode<synchronous>, transform_indices = @transform_12, window_bounds = array<i64: 2, 64, 32>}, {pipeline_mode = #tpu.pipeline_mode<synchronous>, transform_indices = @transform_13, window_bounds = array<i64: 2, 1, 32>}, {pipeline_mode = #tpu.pipeline_mode<synchronous>, transform_indices = @transform_14, window_bounds = array<i64: 2, 1, 32>}, {pipeline_mode = #tpu.pipeline_mode<synchronous>, transform_indices = @transform_15, window_bounds = array<i64: 2, 1, 32>}, {pipeline_mode = #tpu.pipeline_mode<synchronous>, transform_indices = @transform_16, window_bounds = array<i64: 32, 32>}, {pipeline_mode = #tpu.pipeline_mode<synchronous>, transform_indices = @transform_17, window_bounds = array<i64: 1, 32>}, {pipeline_mode = #tpu.pipeline_mode<synchronous>, transform_indices = @transform_18, window_bounds = array<i64: 32, 128>}, {pipeline_mode = #tpu.pipeline_mode<synchronous>, transform_indices = @transform_19, window_bounds = array<i64: 1, 128>}, {transform_indices = @transform_20, window_bounds = array<i64: 1, 8, 128>}]} {
    %c0 = arith.constant 0 : index
    %c0_0 = arith.constant 0 : index
    %c0_1 = arith.constant 0 : index
    %0 = vector.load %arg1[%c0, %c0_0, %c0_1] : memref<1x8x32xf32, #tpu.memory_space<vmem>>, vector<1x8x32xf32>
    %1 = vector.shape_cast %0 : vector<1x8x32xf32> to vector<8x32xf32>
    %c0_2 = arith.constant 0 : index
    %c0_3 = arith.constant 0 : index
    %c0_4 = arith.constant 0 : index
    %2 = vector.load %arg2[%c0_2, %c0_3, %c0_4] : memref<1x1x8xf32, #tpu.memory_space<vmem>>, vector<1x1x8xf32>
    %3 = vector.shape_cast %2 : vector<1x1x8xf32> to vector<1x8xf32>
    %c0_5 = arith.constant 0 : index
    %c0_6 = arith.constant 0 : index
    %4 = vector.load %arg3[%c0_5, %c0_6] : memref<1x32xf32, #tpu.memory_space<vmem>>, vector<1x32xf32>
    %c0_7 = arith.constant 0 : index
    %c0_8 = arith.constant 0 : index
    %5 = vector.load %arg4[%c0_7, %c0_8] : memref<1x32xf32, #tpu.memory_space<vmem>>, vector<1x32xf32>
    %cst = arith.constant dense<0.000000e+00> : vector<8xf32>
    %6 = vector.multi_reduction <add>, %1, %cst [1] : vector<8x32xf32> to vector<8xf32>
    %7 = vector.shape_cast %6 : vector<8xf32> to vector<8x1xf32>
    %cst_9 = arith.constant 3.200000e+01 : f32
    %8 = vector.broadcast %cst_9 : f32 to vector<8x1xf32>
    %9 = arith.divf %7, %8 : vector<8x1xf32>
    %10 = vector.broadcast %9 : vector<8x1xf32> to vector<8x32xf32>
    %11 = arith.subf %1, %10 : vector<8x32xf32>
    %12 = arith.mulf %11, %11 : vector<8x32xf32>
    %cst_10 = arith.constant dense<0.000000e+00> : vector<8xf32>
    %13 = vector.multi_reduction <add>, %12, %cst_10 [1] : vector<8x32xf32> to vector<8xf32>
    %14 = vector.shape_cast %13 : vector<8xf32> to vector<8x1xf32>
    %cst_11 = arith.constant 3.200000e+01 : f32
    %15 = vector.broadcast %cst_11 : f32 to vector<8x1xf32>
    %16 = arith.divf %14, %15 : vector<8x1xf32>
    %17 = vector.broadcast %9 : vector<8x1xf32> to vector<8x32xf32>
    %18 = arith.subf %1, %17 : vector<8x32xf32>
    %cst_12 = arith.constant 9.99999996E-13 : f32
    %19 = vector.broadcast %cst_12 : f32 to vector<8x1xf32>
    %20 = arith.addf %16, %19 : vector<8x1xf32>
    %21 = math.rsqrt %20 : vector<8x1xf32>
    %22 = vector.broadcast %21 : vector<8x1xf32> to vector<8x32xf32>
    %23 = arith.mulf %18, %22 : vector<8x32xf32>
    %24 = vector.broadcast %4 : vector<1x32xf32> to vector<8x32xf32>
    %25 = arith.mulf %23, %24 : vector<8x32xf32>
    %26 = vector.broadcast %5 : vector<1x32xf32> to vector<8x32xf32>
    %27 = arith.addf %25, %26 : vector<8x32xf32>
    %c0_13 = arith.constant 0 : index
    %c0_14 = arith.constant 0 : index
    %c0_15 = arith.constant 0 : index
    %28 = vector.load %arg5[%c0_13, %c0_14, %c0_15] : memref<2x32x96xbf16, #tpu.memory_space<vmem>>, vector<1x32x96xbf16>
    %29 = vector.shape_cast %28 : vector<1x32x96xbf16> to vector<32x96xbf16>
    %30 = arith.truncf %27 : vector<8x32xf32> to vector<8x32xbf16>
    %cst_16 = arith.constant dense<0.000000e+00> : vector<8x96xf32>
    %31 = tpu.matmul %30, %29, %cst_16 {dimension_numbers = #tpu.dot_dimension_numbers<[1], [0], [0], [1], [0, 0, 1, 1], [], []>} : vector<8x32xbf16>, vector<32x96xbf16>, vector<8x96xf32> -> vector<8x96xf32>
    %c0_17 = arith.constant 0 : index
    %c0_18 = arith.constant 0 : index
    %c0_19 = arith.constant 0 : index
    %32 = vector.load %arg6[%c0_17, %c0_18, %c0_19] : memref<2x1x96xf32, #tpu.memory_space<vmem>>, vector<1x1x96xf32>
    %33 = vector.shape_cast %32 : vector<1x1x96xf32> to vector<1x96xf32>
    %34 = vector.broadcast %33 : vector<1x96xf32> to vector<8x96xf32>
    %35 = arith.addf %31, %34 : vector<8x96xf32>
    %36 = vector.extract_strided_slice %35 {offsets = [0, 0], sizes = [8, 16], strides = [1, 1]} : vector<8x96xf32> to vector<8x16xf32>
    %37 = vector.extract_strided_slice %35 {offsets = [0, 32], sizes = [8, 16], strides = [1, 1]} : vector<8x96xf32> to vector<8x16xf32>
    %38 = vector.extract_strided_slice %35 {offsets = [0, 64], sizes = [8, 16], strides = [1, 1]} : vector<8x96xf32> to vector<8x16xf32>
    %cst_20 = arith.constant dense<0.000000e+00> : vector<8x8xf32>
    %39 = tpu.matmul %36, %37, %cst_20 {dimension_numbers = #tpu.dot_dimension_numbers<[1], [1], [0], [0], [0, 0, 1, 0], [], []>} : vector<8x16xf32>, vector<8x16xf32>, vector<8x8xf32> -> vector<8x8xf32>
    %cst_21 = arith.constant 2.500000e-01 : f32
    %40 = vector.broadcast %cst_21 : f32 to vector<8x8xf32>
    %41 = arith.mulf %39, %40 : vector<8x8xf32>
    %42 = vector.broadcast %3 : vector<1x8xf32> to vector<8x8xf32>
    %43 = arith.addf %41, %42 : vector<8x8xf32>
    %cst_22 = arith.constant dense<0xFF800000> : vector<8xf32>
    %44 = vector.multi_reduction <maximumf>, %43, %cst_22 [1] : vector<8x8xf32> to vector<8xf32>
    %45 = vector.shape_cast %44 : vector<8xf32> to vector<8x1xf32>
    %46 = vector.broadcast %45 : vector<8x1xf32> to vector<8x8xf32>
    %47 = arith.subf %43, %46 : vector<8x8xf32>
    %48 = math.exp %47 : vector<8x8xf32>
    %cst_23 = arith.constant dense<0.000000e+00> : vector<8xf32>
    %49 = vector.multi_reduction <add>, %48, %cst_23 [1] : vector<8x8xf32> to vector<8xf32>
    %50 = vector.shape_cast %49 : vector<8xf32> to vector<8x1xf32>
    %51 = tpu.reciprocal %50 {approx = true} : vector<8x1xf32> -> vector<8x1xf32>
    %52 = vector.broadcast %51 : vector<8x1xf32> to vector<8x8xf32>
    %53 = arith.mulf %48, %52 : vector<8x8xf32>
    %cst_24 = arith.constant dense<0.000000e+00> : vector<8x16xf32>
    %54 = tpu.matmul %53, %38, %cst_24 {dimension_numbers = #tpu.dot_dimension_numbers<[1], [0], [0], [1], [0, 0, 1, 1], [], []>} : vector<8x8xf32>, vector<8x16xf32>, vector<8x16xf32> -> vector<8x16xf32>
    %55 = vector.extract_strided_slice %35 {offsets = [0, 16], sizes = [8, 16], strides = [1, 1]} : vector<8x96xf32> to vector<8x16xf32>
    %56 = vector.extract_strided_slice %35 {offsets = [0, 48], sizes = [8, 16], strides = [1, 1]} : vector<8x96xf32> to vector<8x16xf32>
    %57 = vector.extract_strided_slice %35 {offsets = [0, 80], sizes = [8, 16], strides = [1, 1]} : vector<8x96xf32> to vector<8x16xf32>
    %cst_25 = arith.constant dense<0.000000e+00> : vector<8x8xf32>
    %58 = tpu.matmul %55, %56, %cst_25 {dimension_numbers = #tpu.dot_dimension_numbers<[1], [1], [0], [0], [0, 0, 1, 0], [], []>} : vector<8x16xf32>, vector<8x16xf32>, vector<8x8xf32> -> vector<8x8xf32>
    %cst_26 = arith.constant 2.500000e-01 : f32
    %59 = vector.broadcast %cst_26 : f32 to vector<8x8xf32>
    %60 = arith.mulf %58, %59 : vector<8x8xf32>
    %61 = vector.broadcast %3 : vector<1x8xf32> to vector<8x8xf32>
    %62 = arith.addf %60, %61 : vector<8x8xf32>
    %cst_27 = arith.constant dense<0xFF800000> : vector<8xf32>
    %63 = vector.multi_reduction <maximumf>, %62, %cst_27 [1] : vector<8x8xf32> to vector<8xf32>
    %64 = vector.shape_cast %63 : vector<8xf32> to vector<8x1xf32>
    %65 = vector.broadcast %64 : vector<8x1xf32> to vector<8x8xf32>
    %66 = arith.subf %62, %65 : vector<8x8xf32>
    %67 = math.exp %66 : vector<8x8xf32>
    %cst_28 = arith.constant dense<0.000000e+00> : vector<8xf32>
    %68 = vector.multi_reduction <add>, %67, %cst_28 [1] : vector<8x8xf32> to vector<8xf32>
    %69 = vector.shape_cast %68 : vector<8xf32> to vector<8x1xf32>
    %70 = tpu.reciprocal %69 {approx = true} : vector<8x1xf32> -> vector<8x1xf32>
    %71 = vector.broadcast %70 : vector<8x1xf32> to vector<8x8xf32>
    %72 = arith.mulf %67, %71 : vector<8x8xf32>
    %cst_29 = arith.constant dense<0.000000e+00> : vector<8x16xf32>
    %73 = tpu.matmul %72, %57, %cst_29 {dimension_numbers = #tpu.dot_dimension_numbers<[1], [0], [0], [1], [0, 0, 1, 1], [], []>} : vector<8x8xf32>, vector<8x16xf32>, vector<8x16xf32> -> vector<8x16xf32>
    %74 = tpu.concatenate %54, %73 in 1 : vector<8x16xf32>, vector<8x16xf32> -> vector<8x32xf32>
    %c0_30 = arith.constant 0 : index
    %c0_31 = arith.constant 0 : index
    %c0_32 = arith.constant 0 : index
    %75 = vector.load %arg7[%c0_30, %c0_31, %c0_32] : memref<2x32x32xbf16, #tpu.memory_space<vmem>>, vector<1x32x32xbf16>
    %76 = vector.shape_cast %75 : vector<1x32x32xbf16> to vector<32x32xbf16>
    %77 = arith.truncf %74 : vector<8x32xf32> to vector<8x32xbf16>
    %cst_33 = arith.constant dense<0.000000e+00> : vector<8x32xf32>
    %78 = tpu.matmul %77, %76, %cst_33 {dimension_numbers = #tpu.dot_dimension_numbers<[1], [0], [0], [1], [0, 0, 1, 1], [], []>} : vector<8x32xbf16>, vector<32x32xbf16>, vector<8x32xf32> -> vector<8x32xf32>
    %c0_34 = arith.constant 0 : index
    %c0_35 = arith.constant 0 : index
    %c0_36 = arith.constant 0 : index
    %79 = vector.load %arg8[%c0_34, %c0_35, %c0_36] : memref<2x1x32xf32, #tpu.memory_space<vmem>>, vector<1x1x32xf32>
    %80 = vector.shape_cast %79 : vector<1x1x32xf32> to vector<1x32xf32>
    %81 = vector.broadcast %80 : vector<1x32xf32> to vector<8x32xf32>
    %82 = arith.addf %78, %81 : vector<8x32xf32>
    %83 = arith.addf %82, %27 : vector<8x32xf32>
    %c0_37 = arith.constant 0 : index
    %c0_38 = arith.constant 0 : index
    %c0_39 = arith.constant 0 : index
    %84 = vector.load %arg9[%c0_37, %c0_38, %c0_39] : memref<2x1x32xf32, #tpu.memory_space<vmem>>, vector<1x1x32xf32>
    %85 = vector.shape_cast %84 : vector<1x1x32xf32> to vector<1x32xf32>
    %c0_40 = arith.constant 0 : index
    %c0_41 = arith.constant 0 : index
    %c0_42 = arith.constant 0 : index
    %86 = vector.load %arg10[%c0_40, %c0_41, %c0_42] : memref<2x1x32xf32, #tpu.memory_space<vmem>>, vector<1x1x32xf32>
    %87 = vector.shape_cast %86 : vector<1x1x32xf32> to vector<1x32xf32>
    %cst_43 = arith.constant dense<0.000000e+00> : vector<8xf32>
    %88 = vector.multi_reduction <add>, %83, %cst_43 [1] : vector<8x32xf32> to vector<8xf32>
    %89 = vector.shape_cast %88 : vector<8xf32> to vector<8x1xf32>
    %cst_44 = arith.constant 3.200000e+01 : f32
    %90 = vector.broadcast %cst_44 : f32 to vector<8x1xf32>
    %91 = arith.divf %89, %90 : vector<8x1xf32>
    %92 = vector.broadcast %91 : vector<8x1xf32> to vector<8x32xf32>
    %93 = arith.subf %83, %92 : vector<8x32xf32>
    %94 = arith.mulf %93, %93 : vector<8x32xf32>
    %cst_45 = arith.constant dense<0.000000e+00> : vector<8xf32>
    %95 = vector.multi_reduction <add>, %94, %cst_45 [1] : vector<8x32xf32> to vector<8xf32>
    %96 = vector.shape_cast %95 : vector<8xf32> to vector<8x1xf32>
    %cst_46 = arith.constant 3.200000e+01 : f32
    %97 = vector.broadcast %cst_46 : f32 to vector<8x1xf32>
    %98 = arith.divf %96, %97 : vector<8x1xf32>
    %99 = vector.broadcast %91 : vector<8x1xf32> to vector<8x32xf32>
    %100 = arith.subf %83, %99 : vector<8x32xf32>
    %cst_47 = arith.constant 9.99999996E-13 : f32
    %101 = vector.broadcast %cst_47 : f32 to vector<8x1xf32>
    %102 = arith.addf %98, %101 : vector<8x1xf32>
    %103 = math.rsqrt %102 : vector<8x1xf32>
    %104 = vector.broadcast %103 : vector<8x1xf32> to vector<8x32xf32>
    %105 = arith.mulf %100, %104 : vector<8x32xf32>
    %106 = vector.broadcast %85 : vector<1x32xf32> to vector<8x32xf32>
    %107 = arith.mulf %105, %106 : vector<8x32xf32>
    %108 = vector.broadcast %87 : vector<1x32xf32> to vector<8x32xf32>
    %109 = arith.addf %107, %108 : vector<8x32xf32>
    %c0_48 = arith.constant 0 : index
    %c0_49 = arith.constant 0 : index
    %c0_50 = arith.constant 0 : index
    %110 = vector.load %arg11[%c0_48, %c0_49, %c0_50] : memref<2x32x64xbf16, #tpu.memory_space<vmem>>, vector<1x32x64xbf16>
    %111 = vector.shape_cast %110 : vector<1x32x64xbf16> to vector<32x64xbf16>
    %112 = arith.truncf %109 : vector<8x32xf32> to vector<8x32xbf16>
    %cst_51 = arith.constant dense<0.000000e+00> : vector<8x64xf32>
    %113 = tpu.matmul %112, %111, %cst_51 {dimension_numbers = #tpu.dot_dimension_numbers<[1], [0], [0], [1], [0, 0, 1, 1], [], []>} : vector<8x32xbf16>, vector<32x64xbf16>, vector<8x64xf32> -> vector<8x64xf32>
    %c0_52 = arith.constant 0 : index
    %c0_53 = arith.constant 0 : index
    %c0_54 = arith.constant 0 : index
    %114 = vector.load %arg12[%c0_52, %c0_53, %c0_54] : memref<2x1x64xf32, #tpu.memory_space<vmem>>, vector<1x1x64xf32>
    %115 = vector.shape_cast %114 : vector<1x1x64xf32> to vector<1x64xf32>
    %116 = vector.broadcast %115 : vector<1x64xf32> to vector<8x64xf32>
    %117 = arith.addf %113, %116 : vector<8x64xf32>
    %cst_55 = arith.constant 5.000000e-01 : f32
    %118 = vector.broadcast %cst_55 : f32 to vector<8x64xf32>
    %119 = arith.mulf %118, %117 : vector<8x64xf32>
    %cst_56 = arith.constant 4.471500e-02 : f32
    %120 = vector.broadcast %cst_56 : f32 to vector<8x64xf32>
    %121 = arith.mulf %120, %117 : vector<8x64xf32>
    %122 = arith.mulf %121, %117 : vector<8x64xf32>
    %123 = arith.mulf %122, %117 : vector<8x64xf32>
    %124 = arith.addf %117, %123 : vector<8x64xf32>
    %cst_57 = arith.constant 0.797884583 : f32
    %125 = vector.broadcast %cst_57 : f32 to vector<8x64xf32>
    %126 = arith.mulf %125, %124 : vector<8x64xf32>
    %127 = math.tanh %126 : vector<8x64xf32>
    %cst_58 = arith.constant 1.000000e+00 : f32
    %128 = vector.broadcast %cst_58 : f32 to vector<8x64xf32>
    %129 = arith.addf %128, %127 : vector<8x64xf32>
    %130 = arith.mulf %119, %129 : vector<8x64xf32>
    %c0_59 = arith.constant 0 : index
    %c0_60 = arith.constant 0 : index
    %c0_61 = arith.constant 0 : index
    %131 = vector.load %arg13[%c0_59, %c0_60, %c0_61] : memref<2x64x32xbf16, #tpu.memory_space<vmem>>, vector<1x64x32xbf16>
    %132 = vector.shape_cast %131 : vector<1x64x32xbf16> to vector<64x32xbf16>
    %133 = arith.truncf %130 : vector<8x64xf32> to vector<8x64xbf16>
    %cst_62 = arith.constant dense<0.000000e+00> : vector<8x32xf32>
    %134 = tpu.matmul %133, %132, %cst_62 {dimension_numbers = #tpu.dot_dimension_numbers<[1], [0], [0], [1], [0, 0, 1, 1], [], []>} : vector<8x64xbf16>, vector<64x32xbf16>, vector<8x32xf32> -> vector<8x32xf32>
    %c0_63 = arith.constant 0 : index
    %c0_64 = arith.constant 0 : index
    %c0_65 = arith.constant 0 : index
    %135 = vector.load %arg14[%c0_63, %c0_64, %c0_65] : memref<2x1x32xf32, #tpu.memory_space<vmem>>, vector<1x1x32xf32>
    %136 = vector.shape_cast %135 : vector<1x1x32xf32> to vector<1x32xf32>
    %137 = vector.broadcast %136 : vector<1x32xf32> to vector<8x32xf32>
    %138 = arith.addf %134, %137 : vector<8x32xf32>
    %139 = arith.addf %138, %109 : vector<8x32xf32>
    %c0_66 = arith.constant 0 : index
    %c0_67 = arith.constant 0 : index
    %c0_68 = arith.constant 0 : index
    %140 = vector.load %arg15[%c0_66, %c0_67, %c0_68] : memref<2x1x32xf32, #tpu.memory_space<vmem>>, vector<1x1x32xf32>
    %141 = vector.shape_cast %140 : vector<1x1x32xf32> to vector<1x32xf32>
    %c0_69 = arith.constant 0 : index
    %c0_70 = arith.constant 0 : index
    %c0_71 = arith.constant 0 : index
    %142 = vector.load %arg16[%c0_69, %c0_70, %c0_71] : memref<2x1x32xf32, #tpu.memory_space<vmem>>, vector<1x1x32xf32>
    %143 = vector.shape_cast %142 : vector<1x1x32xf32> to vector<1x32xf32>
    %cst_72 = arith.constant dense<0.000000e+00> : vector<8xf32>
    %144 = vector.multi_reduction <add>, %139, %cst_72 [1] : vector<8x32xf32> to vector<8xf32>
    %145 = vector.shape_cast %144 : vector<8xf32> to vector<8x1xf32>
    %cst_73 = arith.constant 3.200000e+01 : f32
    %146 = vector.broadcast %cst_73 : f32 to vector<8x1xf32>
    %147 = arith.divf %145, %146 : vector<8x1xf32>
    %148 = vector.broadcast %147 : vector<8x1xf32> to vector<8x32xf32>
    %149 = arith.subf %139, %148 : vector<8x32xf32>
    %150 = arith.mulf %149, %149 : vector<8x32xf32>
    %cst_74 = arith.constant dense<0.000000e+00> : vector<8xf32>
    %151 = vector.multi_reduction <add>, %150, %cst_74 [1] : vector<8x32xf32> to vector<8xf32>
    %152 = vector.shape_cast %151 : vector<8xf32> to vector<8x1xf32>
    %cst_75 = arith.constant 3.200000e+01 : f32
    %153 = vector.broadcast %cst_75 : f32 to vector<8x1xf32>
    %154 = arith.divf %152, %153 : vector<8x1xf32>
    %155 = vector.broadcast %147 : vector<8x1xf32> to vector<8x32xf32>
    %156 = arith.subf %139, %155 : vector<8x32xf32>
    %cst_76 = arith.constant 9.99999996E-13 : f32
    %157 = vector.broadcast %cst_76 : f32 to vector<8x1xf32>
    %158 = arith.addf %154, %157 : vector<8x1xf32>
    %159 = math.rsqrt %158 : vector<8x1xf32>
    %160 = vector.broadcast %159 : vector<8x1xf32> to vector<8x32xf32>
    %161 = arith.mulf %156, %160 : vector<8x32xf32>
    %162 = vector.broadcast %141 : vector<1x32xf32> to vector<8x32xf32>
    %163 = arith.mulf %161, %162 : vector<8x32xf32>
    %164 = vector.broadcast %143 : vector<1x32xf32> to vector<8x32xf32>
    %165 = arith.addf %163, %164 : vector<8x32xf32>
    %c1 = arith.constant 1 : index
    %c0_77 = arith.constant 0 : index
    %c0_78 = arith.constant 0 : index
    %166 = vector.load %arg5[%c1, %c0_77, %c0_78] : memref<2x32x96xbf16, #tpu.memory_space<vmem>>, vector<1x32x96xbf16>
    %167 = vector.shape_cast %166 : vector<1x32x96xbf16> to vector<32x96xbf16>
    %168 = arith.truncf %165 : vector<8x32xf32> to vector<8x32xbf16>
    %cst_79 = arith.constant dense<0.000000e+00> : vector<8x96xf32>
    %169 = tpu.matmul %168, %167, %cst_79 {dimension_numbers = #tpu.dot_dimension_numbers<[1], [0], [0], [1], [0, 0, 1, 1], [], []>} : vector<8x32xbf16>, vector<32x96xbf16>, vector<8x96xf32> -> vector<8x96xf32>
    %c1_80 = arith.constant 1 : index
    %c0_81 = arith.constant 0 : index
    %c0_82 = arith.constant 0 : index
    %170 = vector.load %arg6[%c1_80, %c0_81, %c0_82] : memref<2x1x96xf32, #tpu.memory_space<vmem>>, vector<1x1x96xf32>
    %171 = vector.shape_cast %170 : vector<1x1x96xf32> to vector<1x96xf32>
    %172 = vector.broadcast %171 : vector<1x96xf32> to vector<8x96xf32>
    %173 = arith.addf %169, %172 : vector<8x96xf32>
    %174 = vector.extract_strided_slice %173 {offsets = [0, 0], sizes = [8, 16], strides = [1, 1]} : vector<8x96xf32> to vector<8x16xf32>
    %175 = vector.extract_strided_slice %173 {offsets = [0, 32], sizes = [8, 16], strides = [1, 1]} : vector<8x96xf32> to vector<8x16xf32>
    %176 = vector.extract_strided_slice %173 {offsets = [0, 64], sizes = [8, 16], strides = [1, 1]} : vector<8x96xf32> to vector<8x16xf32>
    %cst_83 = arith.constant dense<0.000000e+00> : vector<8x8xf32>
    %177 = tpu.matmul %174, %175, %cst_83 {dimension_numbers = #tpu.dot_dimension_numbers<[1], [1], [0], [0], [0, 0, 1, 0], [], []>} : vector<8x16xf32>, vector<8x16xf32>, vector<8x8xf32> -> vector<8x8xf32>
    %cst_84 = arith.constant 2.500000e-01 : f32
    %178 = vector.broadcast %cst_84 : f32 to vector<8x8xf32>
    %179 = arith.mulf %177, %178 : vector<8x8xf32>
    %180 = vector.broadcast %3 : vector<1x8xf32> to vector<8x8xf32>
    %181 = arith.addf %179, %180 : vector<8x8xf32>
    %cst_85 = arith.constant dense<0xFF800000> : vector<8xf32>
    %182 = vector.multi_reduction <maximumf>, %181, %cst_85 [1] : vector<8x8xf32> to vector<8xf32>
    %183 = vector.shape_cast %182 : vector<8xf32> to vector<8x1xf32>
    %184 = vector.broadcast %183 : vector<8x1xf32> to vector<8x8xf32>
    %185 = arith.subf %181, %184 : vector<8x8xf32>
    %186 = math.exp %185 : vector<8x8xf32>
    %cst_86 = arith.constant dense<0.000000e+00> : vector<8xf32>
    %187 = vector.multi_reduction <add>, %186, %cst_86 [1] : vector<8x8xf32> to vector<8xf32>
    %188 = vector.shape_cast %187 : vector<8xf32> to vector<8x1xf32>
    %189 = tpu.reciprocal %188 {approx = true} : vector<8x1xf32> -> vector<8x1xf32>
    %190 = vector.broadcast %189 : vector<8x1xf32> to vector<8x8xf32>
    %191 = arith.mulf %186, %190 : vector<8x8xf32>
    %cst_87 = arith.constant dense<0.000000e+00> : vector<8x16xf32>
    %192 = tpu.matmul %191, %176, %cst_87 {dimension_numbers = #tpu.dot_dimension_numbers<[1], [0], [0], [1], [0, 0, 1, 1], [], []>} : vector<8x8xf32>, vector<8x16xf32>, vector<8x16xf32> -> vector<8x16xf32>
    %193 = vector.extract_strided_slice %173 {offsets = [0, 16], sizes = [8, 16], strides = [1, 1]} : vector<8x96xf32> to vector<8x16xf32>
    %194 = vector.extract_strided_slice %173 {offsets = [0, 48], sizes = [8, 16], strides = [1, 1]} : vector<8x96xf32> to vector<8x16xf32>
    %195 = vector.extract_strided_slice %173 {offsets = [0, 80], sizes = [8, 16], strides = [1, 1]} : vector<8x96xf32> to vector<8x16xf32>
    %cst_88 = arith.constant dense<0.000000e+00> : vector<8x8xf32>
    %196 = tpu.matmul %193, %194, %cst_88 {dimension_numbers = #tpu.dot_dimension_numbers<[1], [1], [0], [0], [0, 0, 1, 0], [], []>} : vector<8x16xf32>, vector<8x16xf32>, vector<8x8xf32> -> vector<8x8xf32>
    %cst_89 = arith.constant 2.500000e-01 : f32
    %197 = vector.broadcast %cst_89 : f32 to vector<8x8xf32>
    %198 = arith.mulf %196, %197 : vector<8x8xf32>
    %199 = vector.broadcast %3 : vector<1x8xf32> to vector<8x8xf32>
    %200 = arith.addf %198, %199 : vector<8x8xf32>
    %cst_90 = arith.constant dense<0xFF800000> : vector<8xf32>
    %201 = vector.multi_reduction <maximumf>, %200, %cst_90 [1] : vector<8x8xf32> to vector<8xf32>
    %202 = vector.shape_cast %201 : vector<8xf32> to vector<8x1xf32>
    %203 = vector.broadcast %202 : vector<8x1xf32> to vector<8x8xf32>
    %204 = arith.subf %200, %203 : vector<8x8xf32>
    %205 = math.exp %204 : vector<8x8xf32>
    %cst_91 = arith.constant dense<0.000000e+00> : vector<8xf32>
    %206 = vector.multi_reduction <add>, %205, %cst_91 [1] : vector<8x8xf32> to vector<8xf32>
    %207 = vector.shape_cast %206 : vector<8xf32> to vector<8x1xf32>
    %208 = tpu.reciprocal %207 {approx = true} : vector<8x1xf32> -> vector<8x1xf32>
    %209 = vector.broadcast %208 : vector<8x1xf32> to vector<8x8xf32>
    %210 = arith.mulf %205, %209 : vector<8x8xf32>
    %cst_92 = arith.constant dense<0.000000e+00> : vector<8x16xf32>
    %211 = tpu.matmul %210, %195, %cst_92 {dimension_numbers = #tpu.dot_dimension_numbers<[1], [0], [0], [1], [0, 0, 1, 1], [], []>} : vector<8x8xf32>, vector<8x16xf32>, vector<8x16xf32> -> vector<8x16xf32>
    %212 = tpu.concatenate %192, %211 in 1 : vector<8x16xf32>, vector<8x16xf32> -> vector<8x32xf32>
    %c1_93 = arith.constant 1 : index
    %c0_94 = arith.constant 0 : index
    %c0_95 = arith.constant 0 : index
    %213 = vector.load %arg7[%c1_93, %c0_94, %c0_95] : memref<2x32x32xbf16, #tpu.memory_space<vmem>>, vector<1x32x32xbf16>
    %214 = vector.shape_cast %213 : vector<1x32x32xbf16> to vector<32x32xbf16>
    %215 = arith.truncf %212 : vector<8x32xf32> to vector<8x32xbf16>
    %cst_96 = arith.constant dense<0.000000e+00> : vector<8x32xf32>
    %216 = tpu.matmul %215, %214, %cst_96 {dimension_numbers = #tpu.dot_dimension_numbers<[1], [0], [0], [1], [0, 0, 1, 1], [], []>} : vector<8x32xbf16>, vector<32x32xbf16>, vector<8x32xf32> -> vector<8x32xf32>
    %c1_97 = arith.constant 1 : index
    %c0_98 = arith.constant 0 : index
    %c0_99 = arith.constant 0 : index
    %217 = vector.load %arg8[%c1_97, %c0_98, %c0_99] : memref<2x1x32xf32, #tpu.memory_space<vmem>>, vector<1x1x32xf32>
    %218 = vector.shape_cast %217 : vector<1x1x32xf32> to vector<1x32xf32>
    %219 = vector.broadcast %218 : vector<1x32xf32> to vector<8x32xf32>
    %220 = arith.addf %216, %219 : vector<8x32xf32>
    %221 = arith.addf %220, %165 : vector<8x32xf32>
    %c1_100 = arith.constant 1 : index
    %c0_101 = arith.constant 0 : index
    %c0_102 = arith.constant 0 : index
    %222 = vector.load %arg9[%c1_100, %c0_101, %c0_102] : memref<2x1x32xf32, #tpu.memory_space<vmem>>, vector<1x1x32xf32>
    %223 = vector.shape_cast %222 : vector<1x1x32xf32> to vector<1x32xf32>
    %c1_103 = arith.constant 1 : index
    %c0_104 = arith.constant 0 : index
    %c0_105 = arith.constant 0 : index
    %224 = vector.load %arg10[%c1_103, %c0_104, %c0_105] : memref<2x1x32xf32, #tpu.memory_space<vmem>>, vector<1x1x32xf32>
    %225 = vector.shape_cast %224 : vector<1x1x32xf32> to vector<1x32xf32>
    %cst_106 = arith.constant dense<0.000000e+00> : vector<8xf32>
    %226 = vector.multi_reduction <add>, %221, %cst_106 [1] : vector<8x32xf32> to vector<8xf32>
    %227 = vector.shape_cast %226 : vector<8xf32> to vector<8x1xf32>
    %cst_107 = arith.constant 3.200000e+01 : f32
    %228 = vector.broadcast %cst_107 : f32 to vector<8x1xf32>
    %229 = arith.divf %227, %228 : vector<8x1xf32>
    %230 = vector.broadcast %229 : vector<8x1xf32> to vector<8x32xf32>
    %231 = arith.subf %221, %230 : vector<8x32xf32>
    %232 = arith.mulf %231, %231 : vector<8x32xf32>
    %cst_108 = arith.constant dense<0.000000e+00> : vector<8xf32>
    %233 = vector.multi_reduction <add>, %232, %cst_108 [1] : vector<8x32xf32> to vector<8xf32>
    %234 = vector.shape_cast %233 : vector<8xf32> to vector<8x1xf32>
    %cst_109 = arith.constant 3.200000e+01 : f32
    %235 = vector.broadcast %cst_109 : f32 to vector<8x1xf32>
    %236 = arith.divf %234, %235 : vector<8x1xf32>
    %237 = vector.broadcast %229 : vector<8x1xf32> to vector<8x32xf32>
    %238 = arith.subf %221, %237 : vector<8x32xf32>
    %cst_110 = arith.constant 9.99999996E-13 : f32
    %239 = vector.broadcast %cst_110 : f32 to vector<8x1xf32>
    %240 = arith.addf %236, %239 : vector<8x1xf32>
    %241 = math.rsqrt %240 : vector<8x1xf32>
    %242 = vector.broadcast %241 : vector<8x1xf32> to vector<8x32xf32>
    %243 = arith.mulf %238, %242 : vector<8x32xf32>
    %244 = vector.broadcast %223 : vector<1x32xf32> to vector<8x32xf32>
    %245 = arith.mulf %243, %244 : vector<8x32xf32>
    %246 = vector.broadcast %225 : vector<1x32xf32> to vector<8x32xf32>
    %247 = arith.addf %245, %246 : vector<8x32xf32>
    %c1_111 = arith.constant 1 : index
    %c0_112 = arith.constant 0 : index
    %c0_113 = arith.constant 0 : index
    %248 = vector.load %arg11[%c1_111, %c0_112, %c0_113] : memref<2x32x64xbf16, #tpu.memory_space<vmem>>, vector<1x32x64xbf16>
    %249 = vector.shape_cast %248 : vector<1x32x64xbf16> to vector<32x64xbf16>
    %250 = arith.truncf %247 : vector<8x32xf32> to vector<8x32xbf16>
    %cst_114 = arith.constant dense<0.000000e+00> : vector<8x64xf32>
    %251 = tpu.matmul %250, %249, %cst_114 {dimension_numbers = #tpu.dot_dimension_numbers<[1], [0], [0], [1], [0, 0, 1, 1], [], []>} : vector<8x32xbf16>, vector<32x64xbf16>, vector<8x64xf32> -> vector<8x64xf32>
    %c1_115 = arith.constant 1 : index
    %c0_116 = arith.constant 0 : index
    %c0_117 = arith.constant 0 : index
    %252 = vector.load %arg12[%c1_115, %c0_116, %c0_117] : memref<2x1x64xf32, #tpu.memory_space<vmem>>, vector<1x1x64xf32>
    %253 = vector.shape_cast %252 : vector<1x1x64xf32> to vector<1x64xf32>
    %254 = vector.broadcast %253 : vector<1x64xf32> to vector<8x64xf32>
    %255 = arith.addf %251, %254 : vector<8x64xf32>
    %cst_118 = arith.constant 5.000000e-01 : f32
    %256 = vector.broadcast %cst_118 : f32 to vector<8x64xf32>
    %257 = arith.mulf %256, %255 : vector<8x64xf32>
    %cst_119 = arith.constant 4.471500e-02 : f32
    %258 = vector.broadcast %cst_119 : f32 to vector<8x64xf32>
    %259 = arith.mulf %258, %255 : vector<8x64xf32>
    %260 = arith.mulf %259, %255 : vector<8x64xf32>
    %261 = arith.mulf %260, %255 : vector<8x64xf32>
    %262 = arith.addf %255, %261 : vector<8x64xf32>
    %cst_120 = arith.constant 0.797884583 : f32
    %263 = vector.broadcast %cst_120 : f32 to vector<8x64xf32>
    %264 = arith.mulf %263, %262 : vector<8x64xf32>
    %265 = math.tanh %264 : vector<8x64xf32>
    %cst_121 = arith.constant 1.000000e+00 : f32
    %266 = vector.broadcast %cst_121 : f32 to vector<8x64xf32>
    %267 = arith.addf %266, %265 : vector<8x64xf32>
    %268 = arith.mulf %257, %267 : vector<8x64xf32>
    %c1_122 = arith.constant 1 : index
    %c0_123 = arith.constant 0 : index
    %c0_124 = arith.constant 0 : index
    %269 = vector.load %arg13[%c1_122, %c0_123, %c0_124] : memref<2x64x32xbf16, #tpu.memory_space<vmem>>, vector<1x64x32xbf16>
    %270 = vector.shape_cast %269 : vector<1x64x32xbf16> to vector<64x32xbf16>
    %271 = arith.truncf %268 : vector<8x64xf32> to vector<8x64xbf16>
    %cst_125 = arith.constant dense<0.000000e+00> : vector<8x32xf32>
    %272 = tpu.matmul %271, %270, %cst_125 {dimension_numbers = #tpu.dot_dimension_numbers<[1], [0], [0], [1], [0, 0, 1, 1], [], []>} : vector<8x64xbf16>, vector<64x32xbf16>, vector<8x32xf32> -> vector<8x32xf32>
    %c1_126 = arith.constant 1 : index
    %c0_127 = arith.constant 0 : index
    %c0_128 = arith.constant 0 : index
    %273 = vector.load %arg14[%c1_126, %c0_127, %c0_128] : memref<2x1x32xf32, #tpu.memory_space<vmem>>, vector<1x1x32xf32>
    %274 = vector.shape_cast %273 : vector<1x1x32xf32> to vector<1x32xf32>
    %275 = vector.broadcast %274 : vector<1x32xf32> to vector<8x32xf32>
    %276 = arith.addf %272, %275 : vector<8x32xf32>
    %277 = arith.addf %276, %247 : vector<8x32xf32>
    %c1_129 = arith.constant 1 : index
    %c0_130 = arith.constant 0 : index
    %c0_131 = arith.constant 0 : index
    %278 = vector.load %arg15[%c1_129, %c0_130, %c0_131] : memref<2x1x32xf32, #tpu.memory_space<vmem>>, vector<1x1x32xf32>
    %279 = vector.shape_cast %278 : vector<1x1x32xf32> to vector<1x32xf32>
    %c1_132 = arith.constant 1 : index
    %c0_133 = arith.constant 0 : index
    %c0_134 = arith.constant 0 : index
    %280 = vector.load %arg16[%c1_132, %c0_133, %c0_134] : memref<2x1x32xf32, #tpu.memory_space<vmem>>, vector<1x1x32xf32>
    %281 = vector.shape_cast %280 : vector<1x1x32xf32> to vector<1x32xf32>
    %cst_135 = arith.constant dense<0.000000e+00> : vector<8xf32>
    %282 = vector.multi_reduction <add>, %277, %cst_135 [1] : vector<8x32xf32> to vector<8xf32>
    %283 = vector.shape_cast %282 : vector<8xf32> to vector<8x1xf32>
    %cst_136 = arith.constant 3.200000e+01 : f32
    %284 = vector.broadcast %cst_136 : f32 to vector<8x1xf32>
    %285 = arith.divf %283, %284 : vector<8x1xf32>
    %286 = vector.broadcast %285 : vector<8x1xf32> to vector<8x32xf32>
    %287 = arith.subf %277, %286 : vector<8x32xf32>
    %288 = arith.mulf %287, %287 : vector<8x32xf32>
    %cst_137 = arith.constant dense<0.000000e+00> : vector<8xf32>
    %289 = vector.multi_reduction <add>, %288, %cst_137 [1] : vector<8x32xf32> to vector<8xf32>
    %290 = vector.shape_cast %289 : vector<8xf32> to vector<8x1xf32>
    %cst_138 = arith.constant 3.200000e+01 : f32
    %291 = vector.broadcast %cst_138 : f32 to vector<8x1xf32>
    %292 = arith.divf %290, %291 : vector<8x1xf32>
    %293 = vector.broadcast %285 : vector<8x1xf32> to vector<8x32xf32>
    %294 = arith.subf %277, %293 : vector<8x32xf32>
    %cst_139 = arith.constant 9.99999996E-13 : f32
    %295 = vector.broadcast %cst_139 : f32 to vector<8x1xf32>
    %296 = arith.addf %292, %295 : vector<8x1xf32>
    %297 = math.rsqrt %296 : vector<8x1xf32>
    %298 = vector.broadcast %297 : vector<8x1xf32> to vector<8x32xf32>
    %299 = arith.mulf %294, %298 : vector<8x32xf32>
    %300 = vector.broadcast %279 : vector<1x32xf32> to vector<8x32xf32>
    %301 = arith.mulf %299, %300 : vector<8x32xf32>
    %302 = vector.broadcast %281 : vector<1x32xf32> to vector<8x32xf32>
    %303 = arith.addf %301, %302 : vector<8x32xf32>
    %304 = vector.extract_strided_slice %303 {offsets = [0, 0], sizes = [1, 32], strides = [1, 1]} : vector<8x32xf32> to vector<1x32xf32>
    %c0_140 = arith.constant 0 : index
    %c0_141 = arith.constant 0 : index
    %305 = vector.load %arg17[%c0_140, %c0_141] : memref<32x32xbf16, #tpu.memory_space<vmem>>, vector<32x32xbf16>
    %306 = arith.truncf %304 : vector<1x32xf32> to vector<1x32xbf16>
    %cst_142 = arith.constant dense<0.000000e+00> : vector<1x32xf32>
    %307 = tpu.matmul %306, %305, %cst_142 {dimension_numbers = #tpu.dot_dimension_numbers<[1], [0], [0], [1], [0, 0, 1, 1], [], []>} : vector<1x32xbf16>, vector<32x32xbf16>, vector<1x32xf32> -> vector<1x32xf32>
    %c0_143 = arith.constant 0 : index
    %c0_144 = arith.constant 0 : index
    %308 = vector.load %arg18[%c0_143, %c0_144] : memref<1x32xf32, #tpu.memory_space<vmem>>, vector<1x32xf32>
    %309 = arith.addf %307, %308 : vector<1x32xf32>
    %310 = math.tanh %309 : vector<1x32xf32>
    %c0_145 = arith.constant 0 : index
    %c0_146 = arith.constant 0 : index
    %311 = vector.load %arg19[%c0_145, %c0_146] : memref<32x128xbf16, #tpu.memory_space<vmem>>, vector<32x128xbf16>
    %312 = arith.truncf %310 : vector<1x32xf32> to vector<1x32xbf16>
    %cst_147 = arith.constant dense<0.000000e+00> : vector<1x128xf32>
    %313 = tpu.matmul %312, %311, %cst_147 {dimension_numbers = #tpu.dot_dimension_numbers<[1], [0], [0], [1], [0, 0, 1, 1], [], []>} : vector<1x32xbf16>, vector<32x128xbf16>, vector<1x128xf32> -> vector<1x128xf32>
    %c0_148 = arith.constant 0 : index
    %c0_149 = arith.constant 0 : index
    %314 = vector.load %arg20[%c0_148, %c0_149] : memref<1x128xf32, #tpu.memory_space<vmem>>, vector<1x128xf32>
    %315 = arith.addf %313, %314 : vector<1x128xf32>
    %316 = vector.shape_cast %315 : vector<1x128xf32> to vector<1x128xf32>
    %317 = vector.broadcast %316 : vector<1x128xf32> to vector<8x128xf32>
    %c0_150 = arith.constant 0 : index
    %c0_151 = arith.constant 0 : index
    %c0_152 = arith.constant 0 : index
    %318 = vector.load %arg21[%c0_150, %c0_151, %c0_152] : memref<1x8x128xf32, #tpu.memory_space<vmem>>, vector<1x8x128xf32>
    %319 = vector.shape_cast %318 : vector<1x8x128xf32> to vector<8x128xf32>
    %320 = vector.shape_cast %317 : vector<8x128xf32> to vector<1x8x128xf32>
    tpu.vector_store %arg21[%c0_150, %c0_151, %c0_152], %320 {strides = array<i32>} : memref<1x8x128xf32, #tpu.memory_space<vmem>>, vector<1x8x128xf32>,
    return
  }
  func.func @transform_0(%arg0: i32) -> (i32, i32, i32) {
    %c0_i32 = arith.constant 0 : i32
    %c0_i32_0 = arith.constant 0 : i32
    %c0_i32_1 = arith.constant 0 : i32
    return %arg0, %c0_i32, %c0_i32_0 : i32, i32, i32
  }
  func.func @transform_1(%arg0: i32) -> (i32, i32, i32) {
    %c0_i32 = arith.constant 0 : i32
    %c0_i32_0 = arith.constant 0 : i32
    %c0_i32_1 = arith.constant 0 : i32
    return %arg0, %c0_i32, %c0_i32_0 : i32, i32, i32
  }
  func.func @transform_2(%arg0: i32) -> (i32, i32) {
    %c0_i32 = arith.constant 0 : i32
    %c0_i32_0 = arith.constant 0 : i32
    %c0_i32_1 = arith.constant 0 : i32
    return %c0_i32, %c0_i32_0 : i32, i32
  }
  func.func @transform_3(%arg0: i32) -> (i32, i32) {
    %c0_i32 = arith.constant 0 : i32
    %c0_i32_0 = arith.constant 0 : i32
    %c0_i32_1 = arith.constant 0 : i32
    return %c0_i32, %c0_i32_0 : i32, i32
  }
  func.func @transform_4(%arg0: i32) -> (i32, i32, i32) {
    %c0_i32 = arith.constant 0 : i32
    %c0_i32_0 = arith.constant 0 : i32
    %c0_i32_1 = arith.constant 0 : i32
    %c0_i32_2 = arith.constant 0 : i32
    return %c0_i32, %c0_i32_0, %c0_i32_1 : i32, i32, i32
  }
  func.func @transform_5(%arg0: i32) -> (i32, i32, i32) {
    %c0_i32 = arith.constant 0 : i32
    %c0_i32_0 = arith.constant 0 : i32
    %c0_i32_1 = arith.constant 0 : i32
    %c0_i32_2 = arith.constant 0 : i32
    return %c0_i32, %c0_i32_0, %c0_i32_1 : i32, i32, i32
  }
  func.func @transform_6(%arg0: i32) -> (i32, i32, i32) {
    %c0_i32 = arith.constant 0 : i32
    %c0_i32_0 = arith.constant 0 : i32
    %c0_i32_1 = arith.constant 0 : i32
    %c0_i32_2 = arith.constant 0 : i32
    return %c0_i32, %c0_i32_0, %c0_i32_1 : i32, i32, i32
  }
  func.func @transform_7(%arg0: i32) -> (i32, i32, i32) {
    %c0_i32 = arith.constant 0 : i32
    %c0_i32_0 = arith.constant 0 : i32
    %c0_i32_1 = arith.constant 0 : i32
    %c0_i32_2 = arith.constant 0 : i32
    return %c0_i32, %c0_i32_0, %c0_i32_1 : i32, i32, i32
  }
  func.func @transform_8(%arg0: i32) -> (i32, i32, i32) {
    %c0_i32 = arith.constant 0 : i32
    %c0_i32_0 = arith.constant 0 : i32
    %c0_i32_1 = arith.constant 0 : i32
    %c0_i32_2 = arith.constant 0 : i32
    return %c0_i32, %c0_i32_0, %c0_i32_1 : i32, i32, i32
  }
  func.func @transform_9(%arg0: i32) -> (i32, i32, i32) {
    %c0_i32 = arith.constant 0 : i32
    %c0_i32_0 = arith.constant 0 : i32
    %c0_i32_1 = arith.constant 0 : i32
    %c0_i32_2 = arith.constant 0 : i32
    return %c0_i32, %c0_i32_0, %c0_i32_1 : i32, i32, i32
  }
  func.func @transform_10(%arg0: i32) -> (i32, i32, i32) {
    %c0_i32 = arith.constant 0 : i32
    %c0_i32_0 = arith.constant 0 : i32
    %c0_i32_1 = arith.constant 0 : i32
    %c0_i32_2 = arith.constant 0 : i32
    return %c0_i32, %c0_i32_0, %c0_i32_1 : i32, i32, i32
  }
  func.func @transform_11(%arg0: i32) -> (i32, i32, i32) {
    %c0_i32 = arith.constant 0 : i32
    %c0_i32_0 = arith.constant 0 : i32
    %c0_i32_1 = arith.constant 0 : i32
    %c0_i32_2 = arith.constant 0 : i32
    return %c0_i32, %c0_i32_0, %c0_i32_1 : i32, i32, i32
  }
  func.func @transform_12(%arg0: i32) -> (i32, i32, i32) {
    %c0_i32 = arith.constant 0 : i32
    %c0_i32_0 = arith.constant 0 : i32
    %c0_i32_1 = arith.constant 0 : i32
    %c0_i32_2 = arith.constant 0 : i32
    return %c0_i32, %c0_i32_0, %c0_i32_1 : i32, i32, i32
  }
  func.func @transform_13(%arg0: i32) -> (i32, i32, i32) {
    %c0_i32 = arith.constant 0 : i32
    %c0_i32_0 = arith.constant 0 : i32
    %c0_i32_1 = arith.constant 0 : i32
    %c0_i32_2 = arith.constant 0 : i32
    return %c0_i32, %c0_i32_0, %c0_i32_1 : i32, i32, i32
  }
  func.func @transform_14(%arg0: i32) -> (i32, i32, i32) {
    %c0_i32 = arith.constant 0 : i32
    %c0_i32_0 = arith.constant 0 : i32
    %c0_i32_1 = arith.constant 0 : i32
    %c0_i32_2 = arith.constant 0 : i32
    return %c0_i32, %c0_i32_0, %c0_i32_1 : i32, i32, i32
  }
  func.func @transform_15(%arg0: i32) -> (i32, i32, i32) {
    %c0_i32 = arith.constant 0 : i32
    %c0_i32_0 = arith.constant 0 : i32
    %c0_i32_1 = arith.constant 0 : i32
    %c0_i32_2 = arith.constant 0 : i32
    return %c0_i32, %c0_i32_0, %c0_i32_1 : i32, i32, i32
  }
  func.func @transform_16(%arg0: i32) -> (i32, i32) {
    %c0_i32 = arith.constant 0 : i32
    %c0_i32_0 = arith.constant 0 : i32
    %c0_i32_1 = arith.constant 0 : i32
    return %c0_i32, %c0_i32_0 : i32, i32
  }
  func.func @transform_17(%arg0: i32) -> (i32, i32) {
    %c0_i32 = arith.constant 0 : i32
    %c0_i32_0 = arith.constant 0 : i32
    %c0_i32_1 = arith.constant 0 : i32
    return %c0_i32, %c0_i32_0 : i32, i32
  }
  func.func @transform_18(%arg0: i32) -> (i32, i32) {
    %c0_i32 = arith.constant 0 : i32
    %c0_i32_0 = arith.constant 0 : i32
    %c0_i32_1 = arith.constant 0 : i32
    return %c0_i32, %c0_i32_0 : i32, i32
  }
  func.func @transform_19(%arg0: i32) -> (i32, i32) {
    %c0_i32 = arith.constant 0 : i32
    %c0_i32_0 = arith.constant 0 : i32
    %c0_i32_1 = arith.constant 0 : i32
    return %c0_i32, %c0_i32_0 : i32, i32
  }
  func.func @transform_20(%arg0: i32) -> (i32, i32, i32) {
    %c0_i32 = arith.constant 0 : i32
    %c0_i32_0 = arith.constant 0 : i32
    %c0_i32_1 = arith.constant 0 : i32
    return %arg0, %c0_i32, %c0_i32_0 : i32, i32, i32
  }
}

</mosaic_0001>

<bundles_post_ra>
// kernel: tpu_custom_call.1
= control target key start
LH: loop header
LB: loop body
LE: loop exit
PB: predicated region body
PF: predicated region fallthrough
CT: control target
= control target key end

     0   :  { %s4250_s0 = inlined_call_operand.hbm [shape: f32[2,8,32], index: 0, kind: input, shape index: {}]   ;;  %s4251_s1 = inlined_call_operand.hbm [shape: f32[2,1,8], index: 1, kind: input, shape index: {}]   ;;  %s4252_s2 = inlined_call_operand.hbm [shape: f32[1,32], index: 2, kind: input, shape index: {}]   ;;  %s4253_s3 = inlined_call_operand.hbm [shape: f32[1,32], index: 3, kind: input, shape index: {}]   ;;  %s4254_s4 = inlined_call_operand.vmem [shape: bf16[2,32,96], index: 4, kind: input, shape index: {}]   ;;  %s4255_s5 = inlined_call_operand.hbm [shape: f32[2,1,96], index: 5, kind: input, shape index: {}]   ;;  %s4256_s6 = inlined_call_operand.vmem [shape: bf16[2,32,32], index: 6, kind: input, shape index: {}]   ;;  %s4257_s7 = inlined_call_operand.hbm [shape: f32[2,1,32], index: 7, kind: input, shape index: {}]   ;;  %s4258_s8 = inlined_call_operand.hbm [shape: f32[2,1,32], index: 8, kind: input, shape index: {}]   ;;  %s4259_s9 = inlined_call_operand.hbm [shape: f32[2,1,32], index: 9, kind: input, shape index: {}]   ;;  %s4260_s10 = inlined_call_operand.vmem [shape: bf16[2,32,64], index: 10, kind: input, shape index: {}]   ;;  %s4261_s11 = inlined_call_operand.hbm [shape: f32[2,1,64], index: 11, kind: input, shape index: {}]   ;;  %s4262_s12 = inlined_call_operand.vmem [shape: bf16[2,64,32], index: 12, kind: input, shape index: {}]   ;;  %s4263_s13 = inlined_call_operand.hbm [shape: f32[2,1,32], index: 13, kind: input, shape index: {}]   ;;  %s4264_s14 = inlined_call_operand.hbm [shape: f32[2,1,32], index: 14, kind: input, shape index: {}]   ;;  %s4265_s15 = inlined_call_operand.hbm [shape: f32[2,1,32], index: 15, kind: input, shape index: {}]   ;;  %s4266_s16 = inlined_call_operand.vmem [shape: bf16[32,32], index: 16, kind: input, shape index: {}]   ;;  %s4267_s17 = inlined_call_operand.hbm [shape: f32[1,32], index: 17, kind: input, shape index: {}]   ;;  %s4268_s18 = inlined_call_operand.vmem [shape: bf16[32,128], index: 18, kind: input, shape index: {}]   ;;  %s4269_s19 = inlined_call_operand.vmem [shape: f32[1,128], index: 19, kind: input, shape index: {}]   ;;  %s4270_s20 = inlined_call_operand.hbm [shape: f32[2,8,128], index: 20, kind: output, shape index: {}]  }
   0x1   :  { %4282 = sst [smem:[#allocation33_spill]] %s4250_s0 }
   0x2   :  { %4283 = sst [smem:[#allocation34_spill]] %s4251_s1 }
   0x3   :  { %4284 = sst [smem:[#allocation35_spill]] %s4252_s2 }
   0x4   :  { %4285 = sst [smem:[#allocation36_spill]] %s4253_s3 }
   0x5   :  { %4286 = sst [smem:[#allocation37_spill]] %s4254_s4 }
   0x6   :  { %4287 = sst [smem:[#allocation38_spill]] %s4255_s5 }
   0x7   :  { %4288 = sst [smem:[#allocation39_spill]] %s4257_s7 }
   0x8   :  { %4289 = sst [smem:[#allocation40_spill]] %s4258_s8 }
   0x9   :  { %4290 = sst [smem:[#allocation41_spill]] %s4259_s9 }
   0xa   :  { %4291 = sst [smem:[#allocation42_spill]] %s4261_s11 }
   0xb   :  { %4292 = sst [smem:[#allocation43_spill]] %s4263_s13 }
   0xc   :  { %4293 = sst [smem:[#allocation44_spill]] %s4264_s14 }
   0xd   :  { %4294 = sst [smem:[#allocation45_spill]] %s4265_s15 }
   0xe   :  { %4295 = sst [smem:[#allocation46_spill]] %s4266_s16 }
   0xf   :  { %4296 = sst [smem:[#allocation47_spill]] %s4268_s18 }
  0x10   :  { %4297 = sst [smem:[#allocation48_spill]] %s4269_s19 }
  0x11   :  { %4298 = sst [smem:[#allocation49_spill]] %s4270_s20 }
  0x12   :  { %25 = vsyncpa [#allocation3], 0 }
  0x13   :  { %27 = vsyncpa [#allocation3 + $0x1], 0 }
  0x14   :  { %28 = vsyncpa [#allocation6], 0 }
  0x15   :  { %30 = vsyncpa [#allocation6 + $0x1], 0 }
  0x16   :  { %31 = vsyncpa [#allocation9], 0 }
  0x17   :  { %32 = vsyncpa [#allocation12], 0 }
  0x18   :  { %33 = vsyncpa [#allocation15], 0 }
  0x19   :  { %34 = vsyncpa [#allocation18], 0 }
  0x1a   :  { %35 = vsyncpa [#allocation21], 0 }
  0x1b   :  { %36 = vsyncpa [#allocation4], 0 }
  0x1c   :  { %38 = vsyncpa [#allocation4 + $0x1], 0  ;;  %s3696_s1 = smov 0   ;;  %s3698_s22 = smov 0  }
  0x1d   :  { %s3700_s23 = smov 0   ;;  %s3702_s24 = smov 0  }
  0x1e LB: > { %s3567_s2 = smov [#allocation7]   ;;  %s3717_s3 = sadd.s32 4294967295, %s3565_s24   ;;  %s3565_s24 = sphi %s3702_s24, %s4346_s24   ;;  %s3561_s23 = sphi %s3700_s23, %s4345_s23   ;;  %s3557_s22 = sphi %s3698_s22, %s4344_s22   ;;  %s3553_s1 = sphi %s3696_s1, %s4343_s1  }
  0x1f   : > { %s518_s25 = sshll.u32 %s3567_s2, 4  ;;  %p2606_p0 = scmp.ge.s32.totalorder %s3565_s24, 1  ;;  %s519_s25 = int_to_ptr.vmem [resolvable:$true] %s518_s25 }
  0x20   : > { %p4276_p1 = scmp.eq.s32.totalorder %s3717_s3, 0  ;;  %p505_p2 = scmp.lt.s32.totalorder %s3565_s24, 3 }
  0x21   : > { %s3568_s27 = smov [#allocation8]   ;;  %s3569_s29 = smov [#allocation11]  }
  0x22   : > { %p3722_p3 = pnand %p2606_p0, %p505_p2  ;;  %s529_s28 = sshll.u32 %s3568_s27, 4  ;;  %s530_s28 = int_to_ptr.vmem [resolvable:$true] %s529_s28 }
  0x23   : > { %s558_s30 = sshll.u32 %s3569_s29, 4  ;;  %s3142_s21 = scalar_lea.vmem %s519_s25, 16  ;;  %s3735_s30 = int_to_ptr.vmem [resolvable:$true] %s558_s30 }
  0x24   : > { %s4299_s26 = scalar_select %p3722_p3, 1, 0 }
  0x25   : > { %p2953_p5 = pneg %p3722_p3  ;;  %p3143_p8 = scmp.ne.s32.totalorder %s519_s25, %s3142_s21 }
  0x26   : > { %s3149_s2 = scalar_lea.vmem %s519_s25, 32  ;;  %p3150_p11 = scmp.lt.s32.totalorder %s519_s25, %s519_s25 }
  0x27   : > { %p3731_p6 = pnand %p2953_p5, %p4276_p1  ;;  %p3151_p12 = scmp.lt.s32.totalorder %s3149_s2, %s3142_s21 }
  0x29   : > { %p3739_p7 = pneg %p3731_p6  ;;  %p3152_p13 = por %p3151_p12, %p3150_p11 }
  0x2b   : > { %p3145_p9 = pnand %p3143_p8, %p3739_p7 }
  0x2d   : > { %p3146_p10 = pneg %p3145_p9 }
  0x2f   : > { %p3153_p0 = pnand %p3152_p13, %p3146_p10 }
  0x31   : > { %3156 = shalt.err (!%p3153_p0)
}
  0x32   : > { %s4302_s20 = sld [smem:[#allocation35_spill]]  ;;  %s3168_s19 = scalar_lea.vmem %s530_s28, 16 }
  0x33   : > { %p3169_p2 = scmp.ne.s32.totalorder %s530_s28, %s3168_s19  ;;  %s3175_s18 = scalar_lea.vmem %s530_s28, 32 }
  0x34   : > { %p3176_p8 = scmp.lt.s32.totalorder %s530_s28, %s530_s28  ;;  %p3177_p9 = scmp.lt.s32.totalorder %s3175_s18, %s3168_s19 }
  0x35   : > { %p3171_p5 = pnand %p3169_p2, %p3739_p7 }
  0x36   : > { %p3178_p1 = por %p3177_p9, %p3176_p8 }
  0x37   : > { %p3172_p4 = pneg %p3171_p5 }
  0x38   : > { %2956 = dma.hbm_to_vmem [thread:$0]  (!%p3731_p6), %s4302_s20, 16, %s519_s25, [#allocation6]  }
  0x39   : > { %p3179_p3 = pnand %p3178_p1, %p3172_p4 }
  0x3b   : > { %3182 = shalt.err (!%p3179_p3)
}
  0x3c   : > { %s4303_s16 = sld [smem:[#allocation36_spill]]  ;;  %s3194_s20 = scalar_lea.vmem %s3735_s30, 32 }
  0x3d   : > { %p3195_p10 = scmp.ne.s32.totalorder %s3735_s30, %s3194_s20  ;;  %p3202_p13 = scmp.lt.s32.totalorder %s3735_s30, %s3735_s30 }
  0x3e   : > { %p3203_p0 = scmp.lt.s32.totalorder %s3194_s20, %s3194_s20 }
  0x3f   : > { %p3197_p11 = pnand %p3195_p10, %p3739_p7 }
  0x40   : > { %p3204_p1 = por %p3203_p0, %p3202_p13 }
  0x41   : > { %p3198_p12 = pneg %p3197_p11 }
  0x42   : > { %2959 = dma.hbm_to_vmem [thread:$0]  (!%p3731_p6), %s4303_s16, 16, %s530_s28, [#allocation9]  }
  0x43   : > { %p3205_p3 = pnand %p3204_p1, %p3198_p12 }
  0x45   : > { %3208 = shalt.err (!%p3205_p3)
}
  0x46   : > { %s3570_s18 = smov 16   ;;  %s3571_s19 = smov 1  }
  0x47   : > { %s4304_s7 = sld [smem:[#allocation39_spill]]  ;;  %s3572_s28 = smov [#allocation14]  }
  0x48   : > { %s584_s27 = sshll.u32 %s3572_s28, 4  ;;  %s3573_s29 = smov [#allocation17]   ;;  %s585_s27 = int_to_ptr.vmem [resolvable:$true] %s584_s27 }
  0x49   : > { %s616_s21 = sshll.u32 %s3573_s29, 4  ;;  %s3220_s2 = scalar_lea.vmem %s585_s27, 32  ;;  %s617_s21 = int_to_ptr.vmem [resolvable:$true] %s616_s21 }
  0x4a   : > { %p3221_p4 = scmp.ne.s32.totalorder %s585_s27, %s3220_s2  ;;  %p3228_p8 = scmp.lt.s32.totalorder %s585_s27, %s585_s27 }
  0x4b   : > { %p3229_p9 = scmp.lt.s32.totalorder %s3220_s2, %s3220_s2 }
  0x4c   : > { %p3223_p2 = pnand %p3221_p4, %p3739_p7 }
  0x4d   : > { %2965 = dma.hbm_to_vmem [thread:$0]  (!%p3731_p6), %s4304_s7, 32, %s3735_s30, [#allocation12], %s3570_s18, %s3570_s18, %s3571_s19  }
  0x4e   : > { %p3224_p5 = pneg %p3223_p2  ;;  %p3230_p10 = por %p3229_p9, %p3228_p8 }
  0x50   : > { %p3231_p11 = pnand %p3230_p10, %p3224_p5 }
  0x52   : > { %3234 = shalt.err (!%p3231_p11)
}
  0x53   : > { %s4305_s9 = sld [smem:[#allocation41_spill]]  ;;  %s3246_s16 = scalar_lea.vmem %s617_s21, 32 }
  0x54   : > { %p3247_p12 = scmp.ne.s32.totalorder %s617_s21, %s3246_s16  ;;  %p3254_p1 = scmp.lt.s32.totalorder %s617_s21, %s617_s21 }
  0x55   : > { %p3255_p3 = scmp.lt.s32.totalorder %s3246_s16, %s3246_s16 }
  0x56   : > { %p3249_p13 = pnand %p3247_p12, %p3739_p7 }
  0x57   : > { %p3256_p4 = por %p3255_p3, %p3254_p1 }
  0x58   : > { %p3250_p0 = pneg %p3249_p13 }
  0x59   : > { %2971 = dma.hbm_to_vmem [thread:$0]  (!%p3731_p6), %s4305_s9, 32, %s585_s27, [#allocation15], %s3570_s18, %s3570_s18, %s3571_s19  }
  0x5a   : > { %p3257_p2 = pnand %p3256_p4, %p3250_p0 }
  0x5c   : > { %3260 = shalt.err (!%p3257_p2)
}
  0x5d   : > { %s4306_s13 = sld [smem:[#allocation43_spill]]  ;;  %s3574_s27 = smov [#allocation20]  }
  0x5e   : > { %s642_s29 = sshll.u32 %s3574_s27, 4  ;;  %s3575_s2 = smov [#allocation10]   ;;  %s643_s29 = int_to_ptr.vmem [resolvable:$true] %s642_s29 }
  0x5f   : > { %s542_s30 = sshll.u32 %s3575_s2, 4  ;;  %s3272_s20 = scalar_lea.vmem %s643_s29, 32  ;;  %s543_s30 = int_to_ptr.vmem [resolvable:$true] %s542_s30 }
  0x60   : > { %p3273_p5 = scmp.ne.s32.totalorder %s643_s29, %s3272_s20  ;;  %p3280_p10 = scmp.lt.s32.totalorder %s643_s29, %s643_s29 }
  0x61   : > { %p3281_p11 = scmp.lt.s32.totalorder %s3272_s20, %s3272_s20 }
  0x62   : > { %p3275_p8 = pnand %p3273_p5, %p3739_p7 }
  0x63   : > { %2977 = dma.hbm_to_vmem [thread:$0]  (!%p3731_p6), %s4306_s13, 32, %s617_s21, [#allocation18], %s3570_s18, %s3570_s18, %s3571_s19  }
  0x64   : > { %p3276_p9 = pneg %p3275_p8  ;;  %p3282_p12 = por %p3281_p11, %p3280_p10 }
  0x66   : > { %p3283_p13 = pnand %p3282_p12, %p3276_p9 }
  0x68   : > { %3286 = shalt.err (!%p3283_p13)
}
  0x69   : > { %s4307_s15 = sld [smem:[#allocation45_spill]]  ;;  %s3298_s25 = scalar_lea.vmem %s543_s30, 32 }
  0x6a   : > { %p3299_p0 = scmp.ne.s32.totalorder %s543_s30, %s3298_s25  ;;  %p3306_p4 = scmp.lt.s32.totalorder %s543_s30, %s543_s30 }
  0x6b   : > { %p3307_p2 = scmp.lt.s32.totalorder %s3298_s25, %s3298_s25 }
  0x6c   : > { %p3301_p1 = pnand %p3299_p0, %p3739_p7 }
  0x6d   : > { %p3308_p5 = por %p3307_p2, %p3306_p4 }
  0x6e   : > { %p3302_p3 = pneg %p3301_p1 }
  0x6f   : > { %2983 = dma.hbm_to_vmem [thread:$0]  (!%p3731_p6), %s4307_s15, 32, %s643_s29, [#allocation21], %s3570_s18, %s3570_s18, %s3571_s19  }
  0x70   : > { %p3309_p8 = pnand %p3308_p5, %p3302_p3 }
  0x72   : > { %3312 = shalt.err (!%p3309_p8)
}
  0x73   : > { %s4308_s5 = sld [smem:[#allocation38_spill]]  ;;  %s3576_s29 = smov [#allocation13]  }
  0x74   : > { %s571_s2 = sshll.u32 %s3576_s29, 4  ;;  %s3577_s20 = smov [#allocation16]   ;;  %s572_s2 = int_to_ptr.vmem [resolvable:$true] %s571_s2 }
  0x75   : > { %s600_s21 = sshll.u32 %s3577_s20, 4  ;;  %s3324_s16 = scalar_lea.vmem %s572_s2, 32  ;;  %s601_s21 = int_to_ptr.vmem [resolvable:$true] %s600_s21 }
  0x76   : > { %p3325_p9 = scmp.ne.s32.totalorder %s572_s2, %s3324_s16  ;;  %p3332_p12 = scmp.lt.s32.totalorder %s572_s2, %s572_s2 }
  0x77   : > { %p3333_p13 = scmp.lt.s32.totalorder %s3324_s16, %s3324_s16 }
  0x78   : > { %p3327_p10 = pnand %p3325_p9, %p3739_p7 }
  0x79   : > { %2962 = dma.hbm_to_vmem [thread:$0]  (!%p3731_p6), %s4308_s5, 32, %s543_s30, [#allocation9], %s3570_s18, %s3570_s18, %s3571_s19  }
  0x7a   : > { %p3328_p11 = pneg %p3327_p10  ;;  %p3334_p0 = por %p3333_p13, %p3332_p12 }
  0x7c   : > { %p3335_p1 = pnand %p3334_p0, %p3328_p11 }
  0x7e   : > { %3338 = shalt.err (!%p3335_p1)
}
  0x7f   : > { %s4309_s8 = sld [smem:[#allocation40_spill]]  ;;  %s3350_s28 = scalar_lea.vmem %s601_s21, 32 }
  0x80   : > { %p3351_p3 = scmp.ne.s32.totalorder %s601_s21, %s3350_s28  ;;  %p3358_p5 = scmp.lt.s32.totalorder %s601_s21, %s601_s21 }
  0x81   : > { %p3359_p8 = scmp.lt.s32.totalorder %s3350_s28, %s3350_s28 }
  0x82   : > { %p3353_p4 = pnand %p3351_p3, %p3739_p7 }
  0x83   : > { %p3360_p9 = por %p3359_p8, %p3358_p5 }
  0x84   : > { %p3354_p2 = pneg %p3353_p4 }
  0x85   : > { %2968 = dma.hbm_to_vmem [thread:$0]  (!%p3731_p6), %s4309_s8, 32, %s572_s2, [#allocation12], %s3570_s18, %s3570_s18, %s3571_s19  }
  0x86   : > { %p3361_p10 = pnand %p3360_p9, %p3354_p2 }
  0x88   : > { %3364 = shalt.err (!%p3361_p10)
}
  0x89   : > { %s4310_s11 = sld [smem:[#allocation42_spill]]  ;;  %s3578_s2 = smov [#allocation19]  }
  0x8a   : > { %s629_s20 = sshll.u32 %s3578_s2, 4  ;;  %s3579_s16 = smov [#allocation22]   ;;  %s630_s20 = int_to_ptr.vmem [resolvable:$true] %s629_s20 }
  0x8b   : > { %s659_s30 = sshll.u32 %s3579_s16, 4  ;;  %s3376_s25 = scalar_lea.vmem %s630_s20, 32  ;;  %s660_s30 = int_to_ptr.vmem [resolvable:$true] %s659_s30 }
  0x8c   : > { %p3377_p11 = scmp.ne.s32.totalorder %s630_s20, %s3376_s25  ;;  %p3384_p0 = scmp.lt.s32.totalorder %s630_s20, %s630_s20 }
  0x8d   : > { %p3385_p1 = scmp.lt.s32.totalorder %s3376_s25, %s3376_s25 }
  0x8e   : > { %p3379_p12 = pnand %p3377_p11, %p3739_p7 }
  0x8f   : > { %2974 = dma.hbm_to_vmem [thread:$0]  (!%p3731_p6), %s4310_s11, 32, %s601_s21, [#allocation15], %s3570_s18, %s3570_s18, %s3571_s19  }
  0x90   : > { %p3380_p13 = pneg %p3379_p12  ;;  %p3386_p3 = por %p3385_p1, %p3384_p0 }
  0x92   : > { %p3387_p4 = pnand %p3386_p3, %p3380_p13 }
  0x94   : > { %3390 = shalt.err (!%p3387_p4)
}
  0x95   : > { %s4311_s14 = sld [smem:[#allocation44_spill]]  ;;  %s3402_s27 = scalar_lea.vmem %s660_s30, 16 }
  0x96   : > { %p3403_p2 = scmp.ne.s32.totalorder %s660_s30, %s3402_s27  ;;  %s3409_s29 = scalar_lea.vmem %s660_s30, 32 }
  0x97   : > { %p3410_p9 = scmp.lt.s32.totalorder %s660_s30, %s660_s30  ;;  %p3411_p10 = scmp.lt.s32.totalorder %s3409_s29, %s3402_s27 }
  0x98   : > { %p3405_p5 = pnand %p3403_p2, %p3739_p7 }
  0x99   : > { %p3412_p11 = por %p3411_p10, %p3410_p9 }
  0x9a   : > { %p3406_p8 = pneg %p3405_p5 }
  0x9b   : > { %2980 = dma.hbm_to_vmem [thread:$0]  (!%p3731_p6), %s4311_s14, 32, %s630_s20, [#allocation18], %s3570_s18, %s3570_s18, %s3571_s19  }
  0x9c   : > { %p3413_p12 = pnand %p3412_p11, %p3406_p8 }
  0x9e   : > { %3416 = shalt.err (!%p3413_p12)
}
  0x9f   : > { %2986 = dma.hbm_to_vmem [thread:$0]  (!%p3731_p6), %s4267_s17, 16, %s660_s30, [#allocation21]  }
  0xa0   : > { %s2605_s0 = sadd.s32 4294967294, %s3565_s24   ;;  %s3851_s4 = sadd.s32 1, %s3565_s24  }
  0xa1   : > { %s51_s18 = sadd.s32 1, %s3561_s23  ;;  %s48_s19 = ssub.s32 %s3565_s24, %s3851_s4 }
  0xa2   : > { %p58_p7 = scmp.ne.s32.totalorder %s3561_s23, %s3557_s22  ;;  %p49_p13 = scmp.eq.s32.totalorder %s48_s19, 0 }
  0xa3   : > { %p59_p0 = scmp.eq.s32.totalorder %s3565_s24, 0  ;;  %p64_p1 = scmp.ne.s32.totalorder %s3557_s22, %s3553_s1 }
  0xa4   : > { %p492_p3 = scmp.eq.s32.totalorder %s3717_s3, 1  ;;  %p4312_p2 = scmp.eq.s32.totalorder %s3717_s3, 0 }
  0xa5   : > { %s3863_s20 = scalar_select %p49_p13, %s3561_s23, %s51_s18  }
  0xa6   : > { %p60_p4 = por %p59_p0, %p58_p7  ;;  %p3867_p5 = por %p4312_p2, %p64_p1 }
  0xa7   : > { %p3871_p6 = por %p492_p3, %p58_p7  ;;  %p498_p8 = scmp.eq.s32.totalorder %s2605_s0, 1 }
  0xa8   : > { %s4313_s30 = scalar_select %p3867_p5, 1, 0 }
  0xa9   : > { %s4314_s25 = scalar_select %p3871_p6, 1, 0 }
  0xaa   : > { %p3009_p9 = scmp.lt.s32.totalorder %s3565_s24, 2  ;;  %s3877_s21 = sand.u32 1, %s3561_s23  }
  0xab   : > { %p3879_p10 = por %p498_p8, %p64_p1  ;;  %s2619_s27 = sshll.u32 %s3877_s21, 3 }
  0xac   : > { %s2620_s29 = sshll.u32 %s3565_s24, 7  ;;  %s4316_s18 = sld [smem:[#allocation33_spill]] }
  0xad   : > { %s4315_s28 = scalar_select %p3879_p10, 1, 0 }
  0xae   : > { %s680_s0 = scalar_lea.vmem [#allocation2], %s2619_s27  ;;  %p3890_p11 = pnand %p3009_p9, %p60_p4 }
  0xaf   : > { %s687_s5 = sshll.u32 %s680_s0, 4  ;;  %s677_s9 = scalar_lea.sflag [#allocation3], %s3877_s21  ;;  %s688_s5 = int_to_ptr.vmem [resolvable:$true] %s687_s5 }
  0xb0   : > { %p3419_p7 = pneg %p3890_p11 }
  0xb2   : > { %s3888_s19 = scalar_lea.hbm %s4316_s18, %s2620_s29  ;;  %s3422_s2 = scalar_lea.hbm %s4316_s18, 256 }
  0xb3   : > { %s3417_s11 = scalar_lea.hbm %s3888_s19, 128  ;;  %p3423_p1 = scmp.lt.s32.totalorder %s3888_s19, %s4316_s18 }
  0xb4   : > { %p3418_p12 = scmp.ne.s32.totalorder %s3888_s19, %s3417_s11  ;;  %p3424_p3 = scmp.lt.s32.totalorder %s3422_s2, %s3417_s11 }
  0xb6   : > { %p3420_p13 = pnand %p3419_p7, %p3418_p12  ;;  %p3425_p4 = por %p3424_p3, %p3423_p1 }
  0xb8   : > { %p3421_p0 = pneg %p3420_p13 }
  0xba   : > { %p3426_p2 = pnand %p3425_p4, %p3421_p0 }
  0xbc   : > { %3429 = shalt.err (!%p3426_p2)
}
  0xbd   : > { %s3430_s8 = scalar_lea.vmem %s688_s5, 128  ;;  %s3580_s13 = smov [#allocation2]  }
  0xbe   : > { %p3431_p8 = scmp.ne.s32.totalorder %s688_s5, %s3430_s8  ;;  %s3435_s14 = sshll.u32 %s3580_s13, 4  ;;  %s3436_s14 = int_to_ptr.vmem [resolvable:$false] %s3435_s14 }
  0xbf   : > { %s3437_s29 = scalar_lea.vmem %s3436_s14, 256  ;;  %p3438_p13 = scmp.lt.s32.totalorder %s688_s5, %s3436_s14 }
  0xc0   : > { %p3433_p9 = pnand %p3431_p8, %p3419_p7  ;;  %p3439_p10 = scmp.lt.s32.totalorder %s3437_s29, %s3430_s8 }
  0xc2   : > { %p3434_p12 = pneg %p3433_p9  ;;  %p3440_p6 = por %p3439_p10, %p3438_p13 }
  0xc4   : > { %p3441_p5 = pnand %p3440_p6, %p3434_p12 }
  0xc6   : > { %3444 = shalt.err (!%p3441_p5)
}
  0xc7   : > { %2990 = dma.hbm_to_vmem [thread:$0]  (!%p3890_p11), %s3888_s19, 128, %s688_s5, %s677_s9  }
  0xc8   : > { %s2621_s11 = sshll.u32 %s3565_s24, 4  ;;  %s4318_s16 = sld [smem:[#allocation34_spill]] }
  0xc9   : > { %s697_s8 = scalar_lea.vmem [#allocation5], %s3877_s21  ;;  %s4319_s0 = sand.u32 1, %s3565_s24  }
  0xca   : > { %s704_s14 = sshll.u32 %s697_s8, 4  ;;  %s695_s29 = scalar_lea.sflag [#allocation6], %s4319_s0  ;;  %s705_s14 = int_to_ptr.vmem [resolvable:$true] %s704_s14 }
  0xce   : > { %s3920_s13 = scalar_lea.hbm %s4318_s16, %s2621_s11  ;;  %s3450_s19 = scalar_lea.hbm %s4318_s16, 32 }
  0xcf   : > { %s3445_s15 = scalar_lea.hbm %s3920_s13, 16  ;;  %p3451_p0 = scmp.lt.s32.totalorder %s3920_s13, %s4318_s16 }
  0xd0   : > { %p3446_p5 = scmp.ne.s32.totalorder %s3920_s13, %s3445_s15  ;;  %p3452_p1 = scmp.lt.s32.totalorder %s3450_s19, %s3445_s15 }
  0xd2   : > { %p3448_p6 = pnand %p3446_p5, %p3419_p7  ;;  %p3453_p3 = por %p3452_p1, %p3451_p0 }
  0xd4   : > { %p3449_p10 = pneg %p3448_p6 }
  0xd6   : > { %p3454_p4 = pnand %p3453_p3, %p3449_p10 }
  0xd8   : > { %3457 = shalt.err (!%p3454_p4)
}
  0xd9   : > { %s3458_s21 = scalar_lea.vmem %s705_s14, 16  ;;  %s3581_s2 = smov [#allocation5]  }
  0xda   : > { %p3459_p2 = scmp.ne.s32.totalorder %s705_s14, %s3458_s21  ;;  %s3463_s8 = sshll.u32 %s3581_s2, 4  ;;  %s3464_s8 = int_to_ptr.vmem [resolvable:$false] %s3463_s8 }
  0xdb   : > { %s3465_s0 = scalar_lea.vmem %s3464_s8, 32  ;;  %p3466_p12 = scmp.lt.s32.totalorder %s705_s14, %s3464_s8 }
  0xdc   : > { %p3461_p8 = pnand %p3459_p2, %p3419_p7  ;;  %p3467_p13 = scmp.lt.s32.totalorder %s3465_s0, %s3458_s21 }
  0xde   : > { %p3462_p9 = pneg %p3461_p8  ;;  %p3468_p5 = por %p3467_p13, %p3466_p12 }
  0xe0   : > { %p3469_p6 = pnand %p3468_p5, %p3462_p9 }
  0xe2   : > { %3472 = shalt.err (!%p3469_p6)
}
  0xe3   : > { %2993 = dma.hbm_to_vmem [thread:$0]  (!%p3890_p11), %s3920_s13, 16, %s705_s14, %s695_s29  }
  0xe4   : > { %p4320_p10 = scmp.ne.s32.totalorder %s4299_s26, 0 }
  0xe5   : > { %s3946_s15 = sand.u32 (!%p4320_p10), 1, %s3557_s22   ;;  %p4321_p7 = scmp.ne.s32.totalorder (!%p4320_p10), %s4313_s30, 0 }
  0xe6   : > { %713 = sbr.rel (%p4320_p10) target bundleno = 6252 (0x186c), region = 100  ;;  %s4281_s5 = sshll.u32 (!%p4320_p10), %s3946_s15, 3 }
  0xe7   : > { %s716_s9 = scalar_lea.sflag (!%p4320_p10), [#allocation3], %s3946_s15  ;;  %s719_s19 = scalar_lea.vmem (!%p4320_p10), [#allocation2], %s4281_s5 }
  0xeb   : > { %3516 = dma.done.wait (%p4321_p7), %s716_s9, 128  }
  0xec   : > { %3518 = vsyncadd (%p4321_p7), %s716_s9, 4294967168  ;;  %s724_s7 = sand.u32 1, %s3717_s3   ;;  %s727_s13 = scalar_lea.vmem [#allocation5], %s3946_s15 }
  0xed   : > { %s725_s26 = scalar_lea.sflag [#allocation6], %s724_s7 }
  0xee   : > { %3520 = dma.done.wait (%p4321_p7), %s725_s26, 16  }
  0xef   : > { %3522 = vsyncadd (%p4321_p7), %s725_s26, 4294967280  ;;  %p4322_p11 = scmp.eq.s32.totalorder %s3717_s3, 0 }
  0xf1   : > { %3524 = dma.done.wait (%p4322_p11), [#allocation6], 16   ;;  %p4323_p0 = pmov %p4322_p11 }
  0xf3   : > { %3526 = vsyncadd (%p4323_p0), [#allocation6], 4294967280  ;;  %p4324_p1 = pmov %p4323_p0 }
  0xf4   : > { %p4325_p3 = pmov %p4323_p0 }
  0xf5   : > { %3528 = dma.done.wait (%p4324_p1), [#allocation9], 48  }
  0xf6   : > { %3530 = vsyncadd (%p4325_p3), [#allocation9], 4294967248  ;;  %p4326_p4 = pmov %p4323_p0 }
  0xf7   : > { %p4327_p2 = pmov %p4323_p0 }
  0xf8   : > { %3532 = dma.done.wait (%p4326_p4), [#allocation12], 64  }
  0xf9   : > { %3534 = vsyncadd (%p4327_p2), [#allocation12], 4294967232  ;;  %p4328_p8 = pmov %p4323_p0 }
  0xfa   : > { %p4329_p9 = pmov %p4323_p0 }
  0xfb   : > { %3536 = dma.done.wait (%p4328_p8), [#allocation15], 64  }
  0xfc   : > { %3538 = vsyncadd (%p4329_p9), [#allocation15], 4294967232  ;;  %p4330_p12 = pmov %p4323_p0 }
  0xfd   : > { %p4331_p13 = pmov %p4323_p0 }
  0xfe   : > { %3540 = dma.done.wait (%p4330_p12), [#allocation18], 64  }
  0xff   : > { %3542 = vsyncadd (%p4331_p13), [#allocation18], 4294967232  ;;  %p4332_p5 = pmov %p4323_p0 }
 0x100   : > { %p4333_p6 = pmov %p4323_p0 }
 0x101   : > { %3544 = dma.done.wait (%p4332_p5), [#allocation21], 48  }
 0x102   : > { %3546 = vsyncadd (%p4333_p6), [#allocation21], 4294967248  ;;  %vm837_vm0 = vcmask 261120   ;;  %v833_v0 = vld [vmem:[%s719_s19] sm:$0xff]  ;;  %s4334_s29 = sld [smem:[#allocation37_spill]]  ;;  %v3582_v8 = vmov 0.0  }
 0x103   : > { %v838_v1 = vsel %vm837_vm0, %v833_v0, 0.0  ;;  %2775 = vmatprep.subr.bf16.mxu0 %v3582_v8  ;;  %vm3583_vm1 = vmmov 0   ;;  %2783 = vmatprep.subr.mxu1 %v3582_v8  ;;  %v2636_v14 = vld [vmem:[#allocation7] ss:$0 sm:$0xff]  ;;  %v2637_v16 = vld [vmem:[#allocation8] ss:$0 sm:$0xff] }
 0x104   : > { %839 = vadd.xlane.f32.xlu0 %v838_v1  ;;  %2779 = vmatprep.mubr.msk.bf16.mxu0 %vm3583_vm1, %v3582_v8  ;;  %v2638_v20 = vld [vmem:[#allocation10] ss:$0 sm:$0xff]  ;;  %s3584_s21 = smov 64   ;;  %s3585_s2 = smov 96   ;;  %vm936_vm2 = vcmask 130048   ;;  %vm1019_vm3 = vcmask 64512  }
 0x105   : > { %2785 = vmatprep.mubr.msk.f32.mxu1 %vm3583_vm1, %v3582_v8  ;;  %v4019_v29 = vld [vmem:[%s727_s13] ss:$0 sm:$0xff]  ;;  %s3586_s8 = smov 80   ;;  %s3587_s0 = smov 112   ;;  %v3077_v60 = vld [vmem:[%s4256_s6 + $0x8] sm:$0xff]   ;;  %vm1492_vm4 = vcmask 523264  }
 0x106   : > { %s3588_s9 = smov 48   ;;  %v3078_v61 = vld [vmem:[%s4256_s6] sm:$0xff]   ;;  %s3589_s30 = smov 16  }
 0x107   : > { %s4336_s19 = sld [smem:[#allocation47_spill]]  ;;  %p4340_p7 = scmp.ne.s32.totalorder %s4314_s25, 0 }
 0x108   : > { %v3075_v7 = vld [vmem:[%s4334_s29 + $0x8] sm:$0xff]   ;;  %v3076_v9 = vld [vmem:[%s4334_s29] sm:$0xff]   ;;  %s4339_s27 = sld [smem:[#allocation49_spill]]  ;;  %s3590_s26 = smov [#allocation23]  }
 0x109   : > { %2776 = vmatpush3.bf16.msra.mxu0 %v3075_v7  ;;  %s3477_s13 = sshll.u32 %s3590_s26, 4  ;;  %s3478_s13 = int_to_ptr.vmem [resolvable:$false] %s3477_s13 }
 0x10a   : > { %2777 = vmatprep.subr.bf16.mxu0 %v3582_v8 }
 0x10d   : > { %2778 = vmatpush3.bf16.msra.mxu0 %v3076_v9 }
 0x10e   : > { %2798 = vmatprep.subr.mxu0 %v3582_v8 }
 0x18d   : > { %v840_v2 = vpop.xlane.xlu0 %839 }
 0x18e   : > { %v842_v3 = vmul.f32 0.03125, %v840_v2 }
 0x190   : > { %v843_v4 = vsub.f32 %v833_v0, %v842_v3  ;;  %v2649_v3 = vld [vmem:[#allocation11] ss:$0 sm:$0xff] }
 0x192   : > { %v844_v5 = vmul.f32 %v843_v4, %v843_v4 }
 0x194   : > { %v845_v6 = vsel %vm837_vm0, %v844_v5, 0.0 }
 0x195   : > { %846 = vadd.xlane.f32.xlu0 %v845_v6 }
 0x21e   : > { %v847_v10 = vpop.xlane.xlu0 %846 }
 0x21f   : > { %v848_v11 = vmul.f32 0.03125, %v847_v10 }
 0x221   : > { %v849_v12 = vadd.f32 1e-12, %v848_v11 }
 0x223   : > { %3099 = vrsqrt.f32 %v849_v12 }
 0x230   : > { %v3100_v13 = vpop.eup %3099 }
 0x231   : > { %v851_v15 = vmul.f32 %v3100_v13, %v843_v4 }
 0x233   : > { %v858_v17 = vmul.f32 %v2636_v14, %v851_v15 }
 0x235   : > { %v4002_v18 = vadd.f32 %v2637_v16, %v858_v17  ;;  %v3079_v17 = vld [vmem:[%s4260_s10 + $0x8] sm:$0xff]  }
 0x237   : > { %v870_v19 = vpack.c.bf16 %v4002_v18, %v4002_v18 }
 0x239   : > { %2780 = vmatmul.mubr.msk.bf16.vlgmr.msra.gmra.mxu0 %vm837_vm0, %v870_v19 }
 0x23a   : > { %2800 = vmatprep.mubr.msk.f32.mxu0 %vm3583_vm1, %v3582_v8 }
 0x2f9   : > { %v927_v21 = vpop.f32.mrf.mxu0 }
 0x2fa   : > { %v928_v22 = vadd.f32 %v2638_v20, %v927_v21 }
 0x2fb   : > { %v2781_v23 = vpop.f32.mrf.mxu0 }
 0x2fc   : > { %1031 = vrot.lane.b32.xlu0 %v928_v22, %s3584_s21  ;;  %934 = vrot.lane.b32.xlu1 %v928_v22, %s3585_s2  ;;  %v2653_v23 = vld [vmem:[#allocation13] ss:$0 sm:$0xff] }
 0x2fd   : > { %v930_v24 = vpop.f32.mrf.mxu0 }
 0x2ff   : > { %v2782_v25 = vpop.f32.mrf.mxu0 }
 0x300   : > { %v2654_v25 = vld [vmem:[#allocation14] ss:$0 sm:$0xff] }
 0x36e   : > { %v935_v26 = vpop.permute.xlu1 %934  ;;  %v1032_v27 = vpop.permute.xlu0 %1031 }
 0x36f   : > { %2784 = vmatpush3.xpose.msk.msra.mxu1 %vm936_vm2, %v935_v26 }
 0x370   : > { %2788 = vmatprep.subr.mxu1 %v3582_v8 }
 0x372   : > { %2786 = vmatmul.mubr.msk.f32.vlgmr.msra.gmra.mxu1 %vm936_vm2, %v928_v22 }
 0x373   : > { %2789 = vmatpush3.msra.mxu1 %v1032_v27  ;;  %2790 = vmatprep.mubr.msk.f32.mxu1 %vm3583_vm1, %v3582_v8 }
 0x374   : > { %2793 = vmatprep.subr.mxu1 %v3582_v8 }
 0x432   : > { %v1007_v28 = vpop.f32.mrf.mxu1 }
 0x433   : > { %v1011_v30 = vmul.f32 0.25, %v1007_v28 }
 0x434   : > { %v2787_v31 = vpop.f32.mrf.mxu1 }
 0x435   : > { %v1018_v32 = vadd.f32 %v4019_v29, %v1011_v30  ;;  %v3081_v30 = vld [vmem:[%s4262_s12 + $0x18] sm:$0xff]   ;;  %v3082_v31 = vld [vmem:[%s4262_s12 + $0x10] sm:$0xff]  }
 0x437   : > { %v1020_v33 = vsel %vm1019_vm3, %v1018_v32, -inf }
 0x438   : > { %1021 = vmax.xlane.f32.xlu1 %v1020_v33  ;;  %v3084_v33 = vld [vmem:[%s4262_s12] sm:$0xff]  }
 0x4c1   : > { %v1022_v34 = vpop.xlane.xlu1 %1021 }
 0x4c2   : > { %v1023_v35 = vsub.f32 %v1018_v32, %v1022_v34  ;;  %v3083_v32 = vld [vmem:[%s4262_s12 + $0x8] sm:$0xff]   ;;  %v2655_v34 = vld [vmem:[#allocation16] ss:$0 sm:$0xff] }
 0x4c4   : > { %v1024_v36 = vmul.f32 1.442695, %v1023_v35 }
 0x4c6   : > { %3101 = vpow2.f32 %v1024_v36 }
 0x4d3   : > { %v3102_v37 = vpop.eup %3101 }
 0x4d4   : > { %v1026_v38 = vsel %vm1019_vm3, %v3102_v37, 0.0 }
 0x4d5   : > { %1027 = vadd.xlane.f32.xlu0 %v1026_v38 }
 0x4eb   : > { %1109 = vrot.lane.b32.xlu0 %v928_v22, %s3586_s8 }
 0x4ef   : > { %1107 = vrot.lane.b32.xlu0 %v928_v22, %s3587_s0 }
 0x55e   : > { %v1028_v39 = vpop.xlane.xlu0 %1027 }
 0x55f   : > { %3103 = vrcp.f32 %v1028_v39 }
 0x562   : > { %v1110_v41 = vpop.permute.xlu0 %1109 }
 0x566   : > { %v1108_v43 = vpop.permute.xlu0 %1107 }
 0x56c   : > { %v3104_v40 = vpop.eup %3103 }
 0x56d   : > { %v1030_v42 = vmul.f32 %v3104_v40, %v3102_v37 }
 0x56f   : > { %2791 = vmatmul.mubr.msk.f32.vlgmr.msra.gmra.mxu1 %vm1019_vm3, %v1030_v42 }
 0x570   : > { %2794 = vmatpush3.xpose.msk.msra.mxu1 %vm936_vm2, %v1110_v41  ;;  %2795 = vmatprep.mubr.msk.f32.mxu1 %vm3583_vm1, %v3582_v8 }
 0x571   : > { %2803 = vmatprep.subr.bf16.mxu1 %v3582_v8 }
 0x573   : > { %2796 = vmatmul.mubr.msk.f32.vlgmr.msra.gmra.mxu1 %vm936_vm2, %v1108_v43 }
 0x574   : > { %2807 = vmatprep.mubr.msk.bf16.mxu1 %vm3583_vm1, %v3582_v8  ;;  %2804 = vmatpush3.bf16.msra.mxu1 %v3077_v60 }
 0x575   : > { %2805 = vmatprep.subr.bf16.mxu1 %v3582_v8 }
 0x578   : > { %2806 = vmatpush3.bf16.msra.mxu1 %v3078_v61 }
 0x579   : > { %2819 = vmatprep.subr.bf16.mxu1 %v3582_v8 }
 0x62f   : > { %v1103_v44 = vpop.f32.mrf.mxu1 }
 0x631   : > { %v2792_v45 = vpop.f32.mrf.mxu1 }
 0x633   : > { %v1181_v46 = vpop.f32.mrf.mxu1 }
 0x634   : > { %v1185_v47 = vmul.f32 0.25, %v1181_v46 }
 0x635   : > { %v2797_v48 = vpop.f32.mrf.mxu1 }
 0x636   : > { %v1186_v49 = vadd.f32 %v4019_v29, %v1185_v47 }
 0x638   : > { %v1187_v50 = vsel %vm1019_vm3, %v1186_v49, -inf }
 0x639   : > { %1188 = vmax.xlane.f32.xlu1 %v1187_v50  ;;  %v2659_v50 = vld [vmem:[#allocation17] ss:$0 sm:$0xff] }
 0x64a   : > { %1198 = vrot.lane.b32.xlu1 %v928_v22, %s3588_s9 }
 0x6c2   : > { %v1189_v51 = vpop.xlane.xlu1 %1188 }
 0x6c3   : > { %v1190_v52 = vsub.f32 %v1186_v49, %v1189_v51 }
 0x6c5   : > { %v1191_v53 = vmul.f32 1.442695, %v1190_v52 }
 0x6c6   : > { %v1199_v54 = vpop.permute.xlu1 %1198 }
 0x6c7   : > { %3105 = vpow2.f32 %v1191_v53  ;;  %2799 = vmatpush3.msra.mxu0 %v1199_v54 }
 0x6c8   : > { %2811 = vmatprep.subr.bf16.mxu0 %v3582_v8 }
 0x6d4   : > { %v3106_v55 = vpop.eup %3105 }
 0x6d5   : > { %v1193_v56 = vsel %vm1019_vm3, %v3106_v55, 0.0 }
 0x6d6   : > { %1194 = vadd.xlane.f32.xlu0 %v1193_v56 }
 0x75f   : > { %v1195_v57 = vpop.xlane.xlu0 %1194 }
 0x760   : > { %3107 = vrcp.f32 %v1195_v57 }
 0x76d   : > { %v3108_v58 = vpop.eup %3107 }
 0x76e   : > { %v1197_v59 = vmul.f32 %v3108_v58, %v3106_v55 }
 0x770   : > { %2801 = vmatmul.mubr.msk.f32.vlgmr.msra.gmra.mxu0 %vm1019_vm3, %v1197_v59 }
 0x771   : > { %2815 = vmatprep.mubr.msk.bf16.mxu0 %vm3583_vm1, %v3582_v8  ;;  %2812 = vmatpush3.bf16.msra.mxu0 %v3079_v17 }
 0x772   : > { %2813 = vmatprep.subr.bf16.mxu0 %v3582_v8 }
 0x830   : > { %v1270_v62 = vpop.f32.mrf.mxu0 }
 0x831   : > { %1275 = vrot.lane.b32.xlu1 %v1270_v62, %s3589_s30 }
 0x832   : > { %v2802_v63 = vpop.f32.mrf.mxu0 }
 0x833   : > { %v3085_v63 = vld [vmem:[%s4334_s29 + $0x18] sm:$0xff]  }
 0x8a3   : > { %v1276_v0 = vpop.permute.xlu1 %1275 }
 0x8a4   : > { %v1278_v1 = vsel %vm936_vm2, %v1103_v44, %v1276_v0  ;;  %v3086_v0 = vld [vmem:[%s4334_s29 + $0x10] sm:$0xff]  }
 0x8a5   : > { %v1283_v2 = vpack.c.bf16 %v1278_v1, %v1278_v1 }
 0x8a7   : > { %2808 = vmatmul.mubr.msk.bf16.vlgmr.msra.gmra.mxu1 %vm837_vm0, %v1283_v2 }
 0x8a8   : > { %2827 = vmatprep.mubr.msk.bf16.mxu1 %vm3583_vm1, %v3582_v8  ;;  %2820 = vmatpush3.bf16.msra.mxu1 %v3081_v30 }
 0x8a9   : > { %2821 = vmatprep.subr.bf16.mxu1 %v3582_v8 }
 0x8ac   : > { %2822 = vmatpush3.bf16.msra.mxu1 %v3082_v31 }
 0x8ad   : > { %2823 = vmatprep.subr.bf16.mxu1 %v3582_v8 }
 0x8b0   : > { %2824 = vmatpush3.bf16.msra.mxu1 %v3083_v32 }
 0x8b1   : > { %2825 = vmatprep.subr.bf16.mxu1 %v3582_v8 }
 0x8b4   : > { %2826 = vmatpush3.bf16.msra.mxu1 %v3084_v33 }
 0x8b5   : > { %2849 = vmatprep.subr.mxu1 %v3582_v8 }
 0x967   : > { %v1340_v4 = vpop.f32.mrf.mxu1 }
 0x968   : > { %v1341_v5 = vadd.f32 %v2649_v3, %v1340_v4 }
 0x969   : > { %v2809_v6 = vpop.f32.mrf.mxu1 }
 0x96a   : > { %v1346_v7 = vadd.f32 %v1341_v5, %v4002_v18  ;;  %v3080_v18 = vld [vmem:[%s4260_s10] sm:$0xff]  }
 0x96b   : > { %v1343_v9 = vpop.f32.mrf.mxu1  ;;  %2814 = vmatpush3.bf16.msra.mxu0 %v3080_v18  ;;  %v2665_v5 = vld [vmem:[#allocation19] ss:$0 sm:$0xff] }
 0x96c   : > { %v1349_v10 = vsel %vm837_vm0, %v1346_v7, 0.0  ;;  %2831 = vmatprep.subr.bf16.mxu0 %v3582_v8 }
 0x96d   : > { %1350 = vadd.xlane.f32.xlu1 %v1349_v10  ;;  %v2810_v11 = vpop.f32.mrf.mxu1 }
 0x9f6   : > { %v1351_v12 = vpop.xlane.xlu1 %1350 }
 0x9f7   : > { %v1352_v13 = vmul.f32 0.03125, %v1351_v12  ;;  %v2671_v12 = vld [vmem:[#allocation10 + $0x1] ss:$0 sm:$0xff] }
 0x9f9   : > { %v1353_v14 = vsub.f32 %v1346_v7, %v1352_v13  ;;  %v2666_v7 = vld [vmem:[#allocation20] ss:$0 sm:$0xff] }
 0x9fb   : > { %v1354_v15 = vmul.f32 %v1353_v14, %v1353_v14 }
 0x9fd   : > { %v1355_v16 = vsel %vm837_vm0, %v1354_v15, 0.0 }
 0x9fe   : > { %1356 = vadd.xlane.f32.xlu0 %v1355_v16 }
 0xa87   : > { %v1357_v19 = vpop.xlane.xlu0 %1356 }
 0xa88   : > { %v1358_v20 = vmul.f32 0.03125, %v1357_v19 }
 0xa8a   : > { %v1359_v21 = vadd.f32 1e-12, %v1358_v20 }
 0xa8c   : > { %3109 = vrsqrt.f32 %v1359_v21 }
 0xa99   : > { %v3110_v22 = vpop.eup %3109 }
 0xa9a   : > { %v1361_v24 = vmul.f32 %v3110_v22, %v1353_v14 }
 0xa9c   : > { %v1368_v26 = vmul.f32 %v2653_v23, %v1361_v24 }
 0xa9e   : > { %v1375_v27 = vadd.f32 %v2654_v25, %v1368_v26 }
 0xaa0   : > { %v1380_v28 = vpack.c.bf16 %v1375_v27, %v1375_v27 }
 0xaa2   : > { %2816 = vmatmul.mubr.msk.bf16.vlgmr.msra.gmra.mxu0 %vm837_vm0, %v1380_v28 }
 0xaa3   : > { %2835 = vmatprep.mubr.msk.bf16.mxu0 %vm3583_vm1, %v3582_v8  ;;  %2832 = vmatpush3.bf16.msra.mxu0 %v3085_v63 }
 0xaa4   : > { %2833 = vmatprep.subr.bf16.mxu0 %v3582_v8 }
 0xaa7   : > { %2834 = vmatpush3.bf16.msra.mxu0 %v3086_v0 }
 0xaa8   : > { %2839 = vmatprep.subr.mxu0 %v3582_v8 }
 0xb62   : > { %v1437_v35 = vpop.f32.mrf.mxu0 }
 0xb63   : > { %v1438_v36 = vadd.f32 %v2655_v34, %v1437_v35 }
 0xb64   : > { %v2817_v37 = vpop.f32.mrf.mxu0 }
 0xb65   : > { %v1444_v38 = vmul.f32 0.044715, %v1438_v36  ;;  %v1443_v46 = vmul.f32 0.5, %v1438_v36 }
 0xb66   : > { %v1440_v39 = vpop.f32.mrf.mxu0 }
 0xb67   : > { %v1445_v40 = vmul.f32 %v1444_v38, %v1438_v36 }
 0xb68   : > { %v2818_v41 = vpop.f32.mrf.mxu0 }
 0xb69   : > { %v1446_v42 = vmul.f32 %v1445_v40, %v1438_v36 }
 0xb6b   : > { %v1447_v43 = vadd.f32 %v1446_v42, %v1438_v36 }
 0xb6d   : > { %v1448_v44 = vmul.f32 0.7978846, %v1447_v43 }
 0xb6f   : > { %3111 = vtanh.f32 %v1448_v44 }
 0xb7c   : > { %v3112_v45 = vpop.eup %3111 }
 0xb7d   : > { %v1450_v47 = vadd.f32 1.0, %v3112_v45 }
 0xb7f   : > { %v1451_v48 = vmul.f32 %v1450_v47, %v1443_v46 }
 0xb81   : > { %v1460_v49 = vpack.c.bf16 %v1451_v48, %v1451_v48 }
 0xb83   : > { %2828 = vmatmul.mubr.msk.bf16.vlgmr.msra.gmra.mxu1 %vm1492_vm4, %v1460_v49  ;;  %v3087_v49 = vld [vmem:[%s4256_s6 + $0x18] sm:$0xff]  }
 0xb84   : > { %2851 = vmatprep.mubr.msk.f32.mxu1 %vm3583_vm1, %v3582_v8 }
 0xc43   : > { %v1530_v51 = vpop.f32.mrf.mxu1 }
 0xc44   : > { %v1531_v52 = vadd.f32 %v2659_v50, %v1530_v51  ;;  %v3088_v50 = vld [vmem:[%s4256_s6 + $0x10] sm:$0xff]  }
 0xc45   : > { %v2829_v53 = vpop.f32.mrf.mxu1 }
 0xc46   : > { %v1536_v54 = vadd.f32 %v1531_v52, %v1375_v27 }
 0xc47   : > { %v1533_v55 = vpop.f32.mrf.mxu1 }
 0xc48   : > { %v1539_v56 = vsel %vm837_vm0, %v1536_v54, 0.0 }
 0xc49   : > { %1540 = vadd.xlane.f32.xlu0 %v1539_v56  ;;  %v2830_v57 = vpop.f32.mrf.mxu1 }
 0xcd2   : > { %v1541_v58 = vpop.xlane.xlu0 %1540 }
 0xcd3   : > { %v1542_v59 = vmul.f32 0.03125, %v1541_v58  ;;  %v2685_v58 = vld [vmem:[#allocation11 + $0x1] ss:$0 sm:$0xff] }
 0xcd5   : > { %v1543_v60 = vsub.f32 %v1536_v54, %v1542_v59 }
 0xcd7   : > { %v1544_v61 = vmul.f32 %v1543_v60, %v1543_v60 }
 0xcd9   : > { %v1545_v62 = vsel %vm837_vm0, %v1544_v61, 0.0 }
 0xcda   : > { %1546 = vadd.xlane.f32.xlu0 %v1545_v62 }
 0xd63   : > { %v1547_v1 = vpop.xlane.xlu0 %1546 }
 0xd64   : > { %v1548_v2 = vmul.f32 0.03125, %v1547_v1 }
 0xd66   : > { %v1549_v3 = vadd.f32 1e-12, %v1548_v2 }
 0xd68   : > { %3113 = vrsqrt.f32 %v1549_v3 }
 0xd75   : > { %v3114_v4 = vpop.eup %3113 }
 0xd76   : > { %v1551_v6 = vmul.f32 %v3114_v4, %v1543_v60 }
 0xd78   : > { %v1558_v9 = vmul.f32 %v2665_v5, %v1551_v6 }
 0xd7a   : > { %v4098_v10 = vadd.f32 %v2666_v7, %v1558_v9  ;;  %v3089_v7 = vld [vmem:[%s4260_s10 + $0x18] sm:$0xff]   ;;  %v3090_v9 = vld [vmem:[%s4260_s10 + $0x10] sm:$0xff]  }
 0xd7c   : > { %v1571_v11 = vpack.c.bf16 %v4098_v10, %v4098_v10 }
 0xd7e   : > { %2836 = vmatmul.mubr.msk.bf16.vlgmr.msra.gmra.mxu0 %vm837_vm0, %v1571_v11 }
 0xd7f   : > { %2841 = vmatprep.mubr.msk.f32.mxu0 %vm3583_vm1, %v3582_v8 }
 0xe3e   : > { %v1629_v13 = vpop.f32.mrf.mxu0 }
 0xe3f   : > { %v1630_v14 = vadd.f32 %v2671_v12, %v1629_v13 }
 0xe40   : > { %v2837_v15 = vpop.f32.mrf.mxu0 }
 0xe41   : > { %1803 = vrot.lane.b32.xlu1 %v1630_v14, %s3586_s8  ;;  %1636 = vrot.lane.b32.xlu0 %v1630_v14, %s3585_s2  ;;  %s2722_s2 = sshll.u32 %s3717_s3, 7  ;;  %s4338_s8 = sshll.u32 %s3946_s15, 3 }
 0xe42   : > { %v1632_v16 = vpop.f32.mrf.mxu0  ;;  %s4207_s5 = scalar_lea.hbm %s4339_s27, %s2722_s2  ;;  %s2398_s3 = scalar_lea.sflag [#allocation4], %s3946_s15 }
 0xe43   : > { %v2690_v16 = vld [vmem:[#allocation14 + $0x1] ss:$0 sm:$0xff] }
 0xe44   : > { %v2838_v17 = vpop.f32.mrf.mxu0 }
 0xe45   : > { %1801 = vrot.lane.b32.xlu0 %v1630_v14, %s3587_s0  ;;  %s831_s0 = scalar_lea.vmem [#allocation23], %s4338_s8 }
 0xeb3   : > { %v1804_v18 = vpop.permute.xlu1 %1803  ;;  %v1637_v19 = vpop.permute.xlu0 %1636 }
 0xeb4   : > { %2840 = vmatpush3.xpose.msk.msra.mxu0 %vm936_vm2, %v1637_v19  ;;  %2850 = vmatpush3.xpose.msk.msra.mxu1 %vm936_vm2, %v1804_v18 }
 0xeb5   : > { %2844 = vmatprep.subr.mxu0 %v3582_v8  ;;  %2859 = vmatprep.subr.bf16.mxu1 %v3582_v8 }
 0xeb7   : > { %2842 = vmatmul.mubr.msk.f32.vlgmr.msra.gmra.mxu0 %vm936_vm2, %v1630_v14  ;;  %v1802_v20 = vpop.permute.xlu0 %1801 }
 0xeb8   : > { %2852 = vmatmul.mubr.msk.f32.vlgmr.msra.gmra.mxu1 %vm936_vm2, %v1802_v20  ;;  %2846 = vmatprep.mubr.msk.f32.mxu0 %vm3583_vm1, %v3582_v8  ;;  %v3091_v20 = vld [vmem:[%s4262_s12 + $0x38] sm:$0xff]  }
 0xeb9   : > { %2863 = vmatprep.mubr.msk.bf16.mxu1 %vm3583_vm1, %v3582_v8  ;;  %2860 = vmatpush3.bf16.msra.mxu1 %v3087_v49 }
 0xeba   : > { %2861 = vmatprep.subr.bf16.mxu1 %v3582_v8 }
 0xebd   : > { %2862 = vmatpush3.bf16.msra.mxu1 %v3088_v50 }
 0xebe   : > { %2875 = vmatprep.subr.bf16.mxu1 %v3582_v8 }
 0xf77   : > { %v1708_v21 = vpop.f32.mrf.mxu0 }
 0xf78   : > { %v1712_v22 = vmul.f32 0.25, %v1708_v21  ;;  %v1875_v23 = vpop.f32.mrf.mxu1  ;;  %v3092_v21 = vld [vmem:[%s4262_s12 + $0x30] sm:$0xff]  }
 0xf79   : > { %v1879_v24 = vmul.f32 0.25, %v1875_v23  ;;  %v2843_v25 = vpop.f32.mrf.mxu0  ;;  %v3094_v23 = vld [vmem:[%s4262_s12 + $0x20] sm:$0xff]  }
 0xf7a   : > { %v2853_v26 = vpop.f32.mrf.mxu1  ;;  %v1713_v27 = vadd.f32 %v4019_v29, %v1712_v22  ;;  %v3093_v22 = vld [vmem:[%s4262_s12 + $0x28] sm:$0xff]  }
 0xf7b   : > { %v1880_v28 = vadd.f32 %v4019_v29, %v1879_v24  ;;  %v2695_v24 = vld [vmem:[#allocation16 + $0x1] ss:$0 sm:$0xff] }
 0xf7c   : > { %v1714_v30 = vsel %vm1019_vm3, %v1713_v27, -inf }
 0xf7d   : > { %1715 = vmax.xlane.f32.xlu0 %v1714_v30  ;;  %v1881_v31 = vsel %vm1019_vm3, %v1880_v28, -inf }
 0xf7e   : > { %1882 = vmax.xlane.f32.xlu1 %v1881_v31 }
 0xf8f   : > { %1892 = vrot.lane.b32.xlu1 %v1630_v14, %s3588_s9  ;;  %s4335_s9 = sld [smem:[#allocation46_spill]] }
0x1006   : > { %v1716_v32 = vpop.xlane.xlu0 %1715 }
0x1007   : > { %v1717_v33 = vsub.f32 %v1713_v27, %v1716_v32  ;;  %v1883_v34 = vpop.xlane.xlu1 %1882 }
0x1008   : > { %v1884_v35 = vsub.f32 %v1880_v28, %v1883_v34 }
0x1009   : > { %v1718_v36 = vmul.f32 1.442695, %v1717_v33 }
0x100a   : > { %v1885_v37 = vmul.f32 1.442695, %v1884_v35 }
0x100b   : > { %3115 = vpow2.f32 %v1718_v36  ;;  %v1893_v46 = vpop.permute.xlu1 %1892 }
0x100c   : > { %3117 = vpow2.f32 %v1885_v37 }
0x1018   : > { %v3116_v38 = vpop.eup %3115 }
0x1019   : > { %v1720_v39 = vsel %vm1019_vm3, %v3116_v38, 0.0  ;;  %v3118_v29 = vpop.eup %3117 }
0x101a   : > { %1721 = vadd.xlane.f32.xlu0 %v1720_v39  ;;  %v1887_v40 = vsel %vm1019_vm3, %v3118_v29, 0.0 }
0x101e   : > { %1888 = vadd.xlane.f32.xlu0 %v1887_v40  ;;  %v2707_v40 = vld [vmem:[#allocation17 + $0x1] ss:$0 sm:$0xff] }
0x1034   : > { %1725 = vrot.lane.b32.xlu0 %v1630_v14, %s3584_s21  ;;  %v2689_v14 = vld [vmem:[#allocation13 + $0x1] ss:$0 sm:$0xff]  ;;  %s4337_s21 = sld [smem:[#allocation48_spill]] }
0x10a3   : > { %v1722_v41 = vpop.xlane.xlu0 %1721 }
0x10a4   : > { %3119 = vrcp.f32 %v1722_v41 }
0x10a7   : > { %v1889_v42 = vpop.xlane.xlu0 %1888 }
0x10a8   : > { %3121 = vrcp.f32 %v1889_v42 }
0x10ab   : > { %v1726_v43 = vpop.permute.xlu0 %1725 }
0x10ac   : > { %2845 = vmatpush3.msra.mxu0 %v1726_v43 }
0x10ad   : > { %2854 = vmatprep.subr.mxu0 %v3582_v8 }
0x10b1   : > { %v3120_v44 = vpop.eup %3119 }
0x10b2   : > { %v1724_v45 = vmul.f32 %v3120_v44, %v3116_v38 }
0x10b4   : > { %2847 = vmatmul.mubr.msk.f32.vlgmr.msra.gmra.mxu0 %vm1019_vm3, %v1724_v45 }
0x10b5   : > { %v3122_v47 = vpop.eup %3121  ;;  %2855 = vmatpush3.msra.mxu0 %v1893_v46  ;;  %2856 = vmatprep.mubr.msk.f32.mxu0 %vm3583_vm1, %v3582_v8 }
0x10b6   : > { %v1891_v48 = vmul.f32 %v3122_v47, %v3118_v29  ;;  %2867 = vmatprep.subr.bf16.mxu0 %v3582_v8 }
0x10b8   : > { %2857 = vmatmul.mubr.msk.f32.vlgmr.msra.gmra.mxu0 %vm1019_vm3, %v1891_v48 }
0x10b9   : > { %2871 = vmatprep.mubr.msk.bf16.mxu0 %vm3583_vm1, %v3582_v8  ;;  %2868 = vmatpush3.bf16.msra.mxu0 %v3089_v7 }
0x10ba   : > { %2869 = vmatprep.subr.bf16.mxu0 %v3582_v8 }
0x10bd   : > { %2870 = vmatpush3.bf16.msra.mxu0 %v3090_v9 }
0x10be   : > { %2887 = vmatprep.subr.bf16.mxu0 %v3582_v8 }
0x1174   : > { %v1797_v51 = vpop.f32.mrf.mxu0 }
0x1176   : > { %v2848_v52 = vpop.f32.mrf.mxu0 }
0x1178   : > { %v1964_v53 = vpop.f32.mrf.mxu0 }
0x1179   : > { %1969 = vrot.lane.b32.xlu1 %v1964_v53, %s3589_s30  ;;  %v3095_v53 = vld [vmem:[%s4335_s9 + $0x8] sm:$0xff]   ;;  %s2411_s30 = sshll.u32 %s831_s0, 4  ;;  %s4209_s30 = int_to_ptr.vmem [resolvable:$true] %s2411_s30 }
0x117a   : > { %v2858_v54 = vpop.f32.mrf.mxu0  ;;  %s3473_s7 = scalar_lea.vmem %s4209_s30, 128  ;;  %p3480_p1 = scmp.lt.s32.totalorder %s4209_s30, %s3478_s13 }
0x117b   : > { %v3096_v54 = vld [vmem:[%s4335_s9] sm:$0xff]   ;;  %p3474_p10 = scmp.ne.s32.totalorder %s4209_s30, %s3473_s7 }
0x117d   : > { %p3475_p11 = pnand %p3474_p10, %p4340_p7 }
0x117f   : > { %p3476_p0 = pneg %p3475_p11 }
0x11eb   : > { %v1970_v55 = vpop.permute.xlu1 %1969 }
0x11ec   : > { %v1972_v56 = vsel %vm936_vm2, %v1797_v51, %v1970_v55 }
0x11ed   : > { %v1978_v57 = vpack.c.bf16 %v1972_v56, %v1972_v56 }
0x11ef   : > { %2864 = vmatmul.mubr.msk.bf16.vlgmr.msra.gmra.mxu1 %vm837_vm0, %v1978_v57 }
0x11f0   : > { %2883 = vmatprep.mubr.msk.bf16.mxu1 %vm3583_vm1, %v3582_v8  ;;  %2876 = vmatpush3.bf16.msra.mxu1 %v3091_v20 }
0x11f1   : > { %2877 = vmatprep.subr.bf16.mxu1 %v3582_v8 }
0x11f4   : > { %2878 = vmatpush3.bf16.msra.mxu1 %v3092_v21 }
0x11f5   : > { %2879 = vmatprep.subr.bf16.mxu1 %v3582_v8 }
0x11f8   : > { %2880 = vmatpush3.bf16.msra.mxu1 %v3093_v22 }
0x11f9   : > { %2881 = vmatprep.subr.bf16.mxu1 %v3582_v8 }
0x11fc   : > { %2882 = vmatpush3.bf16.msra.mxu1 %v3094_v23 }
0x12af   : > { %v2036_v59 = vpop.f32.mrf.mxu1 }
0x12b0   : > { %v2037_v60 = vadd.f32 %v2685_v58, %v2036_v59  ;;  %v2713_v59 = vld [vmem:[#allocation19 + $0x1] ss:$0 sm:$0xff] }
0x12b1   : > { %v2865_v61 = vpop.f32.mrf.mxu1 }
0x12b2   : > { %v2042_v62 = vadd.f32 %v2037_v60, %v4098_v10  ;;  %v2714_v61 = vld [vmem:[#allocation20 + $0x1] ss:$0 sm:$0xff] }
0x12b3   : > { %v2039_v63 = vpop.f32.mrf.mxu1 }
0x12b4   : > { %v2047_v0 = vsel %vm837_vm0, %v2042_v62, 0.0 }
0x12b5   : > { %2048 = vadd.xlane.f32.xlu0 %v2047_v0  ;;  %v2866_v1 = vpop.f32.mrf.mxu1 }
0x12b6   : > { %v3097_v1 = vld [vmem:[%s4336_s19 + $0x8] sm:$0xff]  }
0x133e   : > { %v2049_v2 = vpop.xlane.xlu0 %2048 }
0x133f   : > { %v2050_v3 = vmul.f32 0.03125, %v2049_v2  ;;  %v3098_v2 = vld [vmem:[%s4336_s19] sm:$0xff]  }
0x1341   : > { %v2051_v4 = vsub.f32 %v2042_v62, %v2050_v3  ;;  %v2274_v3 = vld [vmem:[#allocation22] sm:$0x1] }
0x1343   : > { %v2052_v5 = vmul.f32 %v2051_v4, %v2051_v4 }
0x1345   : > { %v2053_v6 = vsel %vm837_vm0, %v2052_v5, 0.0 }
0x1346   : > { %2054 = vadd.xlane.f32.xlu1 %v2053_v6 }
0x13cf   : > { %v2055_v10 = vpop.xlane.xlu1 %2054 }
0x13d0   : > { %v2056_v11 = vmul.f32 0.03125, %v2055_v10 }
0x13d2   : > { %v2057_v12 = vadd.f32 1e-12, %v2056_v11 }
0x13d4   : > { %3123 = vrsqrt.f32 %v2057_v12  ;;  %v2392_v12 = vlaneseq }
0x13e1   : > { %v3124_v13 = vpop.eup %3123 }
0x13e2   : > { %v2059_v15 = vmul.f32 %v3124_v13, %v2051_v4  ;;  %v2336_v13 = vld [vmem:[%s4337_s21] sm:$0x1]  ;;  %s3479_s21 = scalar_lea.vmem %s3478_s13, 256 }
0x13e3   : > { %p3481_p3 = scmp.lt.s32.totalorder %s3479_s21, %s3473_s7 }
0x13e4   : > { %v2066_v17 = vmul.f32 %v2689_v14, %v2059_v15 }
0x13e5   : > { %p3482_p4 = por %p3481_p3, %p3480_p1 }
0x13e6   : > { %v2073_v18 = vadd.f32 %v2690_v16, %v2066_v17 }
0x13e7   : > { %p3483_p2 = pnand %p3482_p4, %p3476_p0 }
0x13e8   : > { %v2079_v19 = vpack.c.bf16 %v2073_v18, %v2073_v18 }
0x13ea   : > { %2872 = vmatmul.mubr.msk.bf16.vlgmr.msra.gmra.mxu0 %vm837_vm0, %v2079_v19 }
0x13eb   : > { %2891 = vmatprep.mubr.msk.bf16.mxu0 %vm3583_vm1, %v3582_v8  ;;  %2888 = vmatpush3.bf16.msra.mxu0 %v3095_v53 }
0x13ec   : > { %2889 = vmatprep.subr.bf16.mxu0 %v3582_v8 }
0x13ef   : > { %2890 = vmatpush3.bf16.msra.mxu0 %v3096_v54 }
0x13f0   : > { %2895 = vmatprep.subr.bf16.mxu0 %v3582_v8 }
0x14aa   : > { %v2137_v25 = vpop.f32.mrf.mxu0 }
0x14ab   : > { %v2138_v26 = vadd.f32 %v2695_v24, %v2137_v25 }
0x14ac   : > { %v2873_v27 = vpop.f32.mrf.mxu0 }
0x14ad   : > { %v2144_v28 = vmul.f32 0.044715, %v2138_v26  ;;  %v2143_v37 = vmul.f32 0.5, %v2138_v26 }
0x14ae   : > { %v2140_v30 = vpop.f32.mrf.mxu0 }
0x14af   : > { %v2145_v31 = vmul.f32 %v2144_v28, %v2138_v26 }
0x14b0   : > { %v2874_v32 = vpop.f32.mrf.mxu0 }
0x14b1   : > { %v2146_v33 = vmul.f32 %v2145_v31, %v2138_v26 }
0x14b3   : > { %v2147_v34 = vadd.f32 %v2146_v33, %v2138_v26 }
0x14b5   : > { %v2148_v35 = vmul.f32 0.7978846, %v2147_v34 }
0x14b7   : > { %3125 = vtanh.f32 %v2148_v35 }
0x14c4   : > { %v3126_v36 = vpop.eup %3125 }
0x14c5   : > { %v2150_v38 = vadd.f32 1.0, %v3126_v36 }
0x14c7   : > { %v2151_v39 = vmul.f32 %v2150_v38, %v2143_v37 }
0x14c9   : > { %v2161_v29 = vpack.c.bf16 %v2151_v39, %v2151_v39 }
0x14cb   : > { %2884 = vmatmul.mubr.msk.bf16.vlgmr.msra.gmra.mxu1 %vm1492_vm4, %v2161_v29 }
0x158b   : > { %v2231_v41 = vpop.f32.mrf.mxu1 }
0x158c   : > { %v2232_v42 = vadd.f32 %v2707_v40, %v2231_v41 }
0x158d   : > { %v2885_v43 = vpop.f32.mrf.mxu1 }
0x158e   : > { %v2237_v44 = vadd.f32 %v2232_v42, %v2073_v18 }
0x158f   : > { %v2234_v45 = vpop.f32.mrf.mxu1 }
0x1590   : > { %v2242_v46 = vsel %vm837_vm0, %v2237_v44, 0.0 }
0x1591   : > { %2243 = vadd.xlane.f32.xlu0 %v2242_v46  ;;  %v2886_v47 = vpop.f32.mrf.mxu1 }
0x161a   : > { %v2244_v48 = vpop.xlane.xlu0 %2243 }
0x161b   : > { %v2245_v49 = vmul.f32 0.03125, %v2244_v48 }
0x161d   : > { %v2246_v50 = vsub.f32 %v2237_v44, %v2245_v49 }
0x161f   : > { %v2247_v51 = vmul.f32 %v2246_v50, %v2246_v50 }
0x1621   : > { %v2248_v52 = vsel %vm837_vm0, %v2247_v51, 0.0 }
0x1622   : > { %2249 = vadd.xlane.f32.xlu0 %v2248_v52 }
0x16ab   : > { %v2250_v55 = vpop.xlane.xlu0 %2249 }
0x16ac   : > { %v2251_v56 = vmul.f32 0.03125, %v2250_v55 }
0x16ae   : > { %v2252_v57 = vadd.f32 1e-12, %v2251_v56 }
0x16b0   : > { %3127 = vrsqrt.f32 %v2252_v57 }
0x16bd   : > { %v3128_v58 = vpop.eup %3127 }
0x16be   : > { %v2254_v60 = vmul.f32 %v3128_v58, %v2246_v50 }
0x16c0   : > { %v2261_v62 = vmul.f32 %v2713_v59, %v2254_v60 }
0x16c2   : > { %v2268_v63 = vadd.f32 %v2714_v61, %v2261_v62 }
0x16c4   : > { %v2273_v0 = vpack.c.bf16 %v2268_v63, %v2268_v63 }
0x16c6   : > { %2892 = vmatmul.mubr.msk.bf16.vlgmr.msra.gmra.mxu0 %vm837_vm0, %v2273_v0 }
0x16c7   : > { %2899 = vmatprep.mubr.msk.bf16.mxu0 %vm3583_vm1, %v3582_v8  ;;  %2896 = vmatpush3.bf16.msra.mxu0 %v3097_v1 }
0x16c8   : > { %2897 = vmatprep.subr.bf16.mxu0 %v3582_v8  ;;  %v2393_v8 = vshrl.u32 %v2392_v12, 7 }
0x16ca   : > { %v2394_v14 = vsub.s32 0, %v2393_v8 }
0x16cb   : > { %2898 = vmatpush3.bf16.msra.mxu0 %v3098_v2 }
0x1786   : > { %v2324_v4 = vpop.f32.mrf.mxu0 }
0x1787   : > { %v2325_v5 = vadd.f32 %v2324_v4, %v2274_v3 }
0x1788   : > { %v2893_v6 = vpop.f32.mrf.mxu0 }
0x1789   : > { %3129 = vtanh.f32 %v2325_v5 }
0x178a   : > { %v2327_v7 = vpop.f32.mrf.mxu0 }
0x178c   : > { %v2894_v9 = vpop.f32.mrf.mxu0 }
0x1796   : > { %v3130_v10 = vpop.eup %3129 }
0x1797   : > { %v2335_v11 = vpack.c.bf16 %v3130_v10, %v3130_v10 }
0x1799   : > { %2900 = vmatmul.mubr.msk.bf16.vlgmr.msra.gmra.mxu0 %vm837_vm0, %v2335_v11 }
0x1859   : > { %v2386_v15 = vpop.f32.mrf.mxu0 }
0x185a   : > { %v2387_v16 = vadd.f32 %v2386_v15, %v2336_v13 }
0x185b   : > { %v2901_v17 = vpop.f32.mrf.mxu0 }
0x185c   : > { %v2395_v18 = vrot.slane %v2387_v16, %v2394_v14 }
0x185d   : > { %v2389_v19 = vpop.f32.mrf.mxu0 }
0x185e   : > { %2396 = vst [vmem:[%s831_s0] sm:$0xff] %v2395_v18 }
0x185f   : > { %v2902_v20 = vpop.f32.mrf.mxu0 }
0x1860   : > { %3486 = shalt.err (!%p3483_p2)
}
0x1861   : > { %s3487_s2 = scalar_lea.hbm %s4207_s5, 128  ;;  %s3491_s0 = scalar_lea.hbm %s4339_s27, 256 }
0x1862   : > { %p3488_p8 = scmp.ne.s32.totalorder %s4207_s5, %s3487_s2  ;;  %p3492_p13 = scmp.lt.s32.totalorder %s4207_s5, %s4339_s27 }
0x1863   : > { %p3493_p5 = scmp.lt.s32.totalorder %s3491_s0, %s3487_s2 }
0x1864   : > { %p3489_p9 = pnand %p3488_p8, %p4340_p7 }
0x1865   : > { %p3494_p6 = por %p3493_p5, %p3492_p13 }
0x1866   : > { %p3490_p12 = pneg %p3489_p9 }
0x1868   : > { %p3495_p10 = pnand %p3494_p6, %p3490_p12 }
0x186a   : > { %3498 = shalt.err (!%p3495_p10)
}
0x186b   : > { %2951 = dma.vmem_to_hbm [thread:$0]  (%p4340_p7), %s4209_s30, 128, %s4207_s5, %s2398_s3  }
0x186c PF: > { %s2423_s7 = sand.u32 1, %s3553_s1   ;;  %p4341_p11 = scmp.ne.s32.totalorder %s4315_s28, 0 }
0x186d   : > { %p4342_p0 = scmp.ge.s32.totalorder %s3565_s24, 2  ;;  %s2424_s26 = scalar_lea.sflag [#allocation4], %s2423_s7 }
0x186f   : > { %p2995_p1 = pnand %p4342_p0, %p4341_p11 }
0x1871   : > { %p2996_p3 = pneg %p2995_p1 }
0x1873   : > { %3548 = dma.done.wait (%p2996_p3), %s2424_s26, 128  }
0x1874   : > { %3550 = vsyncadd (%p2996_p3), %s2424_s26, 4294967168  ;;  %p41_p4 = scmp.ge.s32.totalorder %s3851_s4, 4   ;;  %s4343_s1 = smov %s3557_s22 }
0x1875   : > { %s4344_s22 = smov %s3561_s23  ;;  %s4345_s23 = smov %s3863_s20 }
0x1876   : > { %s4346_s24 = smov %s3851_s4  ;;  %43 = sbr.rel (!%p41_p4) target bundleno = 30 (0x1e), region = 214 }
0x187b   :  { %2429 = vsyncpa [#allocation3], 1 }
0x187c   :  { %2431 = vsyncpa [#allocation3 + $0x1], 1 }
0x187d   :  { %2432 = vsyncpa [#allocation6], 1 }
0x187e   :  { %2434 = vsyncpa [#allocation6 + $0x1], 1 }
0x187f   :  { %2435 = vsyncpa [#allocation9], 1 }
0x1880   :  { %2436 = vsyncpa [#allocation12], 1 }
0x1881   :  { %2437 = vsyncpa [#allocation15], 1 }
0x1882   :  { %2438 = vsyncpa [#allocation18], 1 }
0x1883   :  { %2439 = vsyncpa [#allocation21], 1 }
0x1884   :  { %2440 = vsyncpa [#allocation4], 1 }
0x1885   :  { %2442 = vsyncpa [#allocation4 + $0x1], 1 }

</bundles_post_ra>
